<compile_context>
chip_gen: v6e
topology: v6e:2x2x1
jax: 0.10.0
libtpu: 0.0.40
codegen_flags: <defaults>
</compile_context>

<pallas_src>
import jax
import jax.numpy as jnp
from jax.experimental import pallas as pl
from jax.experimental.pallas import tpu as pltpu

INPUT_SIZE = 7                  # Conv1d in_channels
SEQ_LEN = 8                     # 64 * SEQ_LEN must equal the LSTM input_size (512)
HIDDEN = 64                     # LSTM hidden size (per direction)
CONV_CH = 64
LSTM_IN = CONV_CH * SEQ_LEN     # 512
GATE = 2 * HIDDEN               # 128: [fwd | bwd] halves of one gate
HALF = 4 * CONV_CH              # 256: one 4-timestep half of the feature row
HEAD_PAD = 128                  # lane-dense head / output width


# ----------------------------- fused kernel ---------------------------------

def _mrn_kernel(x_ref, w1_ref, w2_ref, wih_ref, whh_ref, wh_ref, bias_ref,
                out_ref):
    f32, bf16 = jnp.float32, jnp.bfloat16
    bias = bias_ref[...]                                   # (8, 512) f32
    b1 = bias[0:1, 0:HALF]                                 # conv1 bias (tiled x4)
    b2 = bias[1:2, 0:HALF]                                 # conv2 bias (tiled x4)
    bg = bias[2:3, :]                                      # LSTM gate bias
    bh = bias[3:4, 0:HEAD_PAD]                             # folded head bias

    x = x_ref[...]                                         # (BM, 56) bf16, l-major
    w1 = w1_ref[...]                                       # (28, 256) bf16
    w2 = w2_ref[...]                                       # (256, 256) bf16

    # conv1 + ReLU then conv2 + ReLU (kernel_size=1 Conv1d == per-position
    # matmul), processed as two 4-timestep halves so K/N = 256 fills one MXU
    # weight tile.  Dropout -> identity.
    def conv(xh):
        h = jnp.dot(xh, w1, preferred_element_type=f32) + b1
        h = jnp.maximum(h, 0.0).astype(bf16)
        h = jnp.dot(h, w2, preferred_element_type=f32) + b2
        return jnp.maximum(h, 0.0).astype(bf16)            # (BM, 256)

    f_lo = conv(x[:, 0:4 * INPUT_SIZE])                    # timesteps 0..3
    f_hi = conv(x[:, 4 * INPUT_SIZE:8 * INPUT_SIZE])       # timesteps 4..7

    # LSTM input projection + gate bias, shared by BOTH timesteps (the module
    # feeds the identical conv features to bilstmf twice).  The K split matches
    # the two feature halves, so no concat/reshape is ever materialized.
    proj = (jnp.dot(f_lo, wih_ref[0:HALF, :], preferred_element_type=f32)
            + jnp.dot(f_hi, wih_ref[HALF:2 * HALF, :], preferred_element_type=f32)
            + bg)                                          # (BM, 512)

    # --- timestep 1: zero initial (h, c) -> recurrent matmul and f*c0 skipped.
    sg1 = jax.nn.sigmoid(proj[:, 0:2 * GATE])              # i, o gates
    i1 = sg1[:, 0:GATE]
    o1 = sg1[:, GATE:2 * GATE]
    g1 = jnp.tanh(proj[:, 3 * GATE:4 * GATE])
    c1 = i1 * g1
    h1 = o1 * jnp.tanh(c1)                                 # (BM, 128) == lstm_outf

    # --- timestep 2: reuse proj; add the recurrent contribution.
    gates2 = proj + jnp.dot(h1.astype(bf16), whh_ref[...],
                            preferred_element_type=f32)
    sg2 = jax.nn.sigmoid(gates2[:, 0:3 * GATE])            # i, o, f gates
    i2 = sg2[:, 0:GATE]
    o2 = sg2[:, GATE:2 * GATE]
    f2 = sg2[:, 2 * GATE:3 * GATE]
    g2 = jnp.tanh(gates2[:, 3 * GATE:4 * GATE])
    c2 = f2 * c1 + i2 * g2
    h2 = o2 * jnp.tanh(c2)                                 # (BM, 128) == lstm_outs

    # Folded (linearf|linears) @ (networks[0]|networks[1]) head: one (256,128)
    # matmul, lane-dense output (col 0 = predf, col 1 = preds, rest zero).
    cat = jnp.concatenate([h1, h2], axis=1).astype(bf16)   # (BM, 256)
    out_ref[...] = jnp.dot(cat, wh_ref[...], preferred_element_type=f32) + bh


# ----------------------------- wrapper ---------------------------------------

def _round_up(n, m):
    return ((n + m - 1) // m) * m


def mrn_forward(x, kp, *, block_batch=256):
    """x: (B, SEQ_LEN, INPUT_SIZE) f32; kp: prepared kernel params."""
    B, L, C = x.shape
    assert C == INPUT_SIZE and L == SEQ_LEN
    x2d = x.reshape(B, L * C).astype(jnp.bfloat16)          # bf16 input DMA

    bm = _round_up(min(block_batch, B), 8)                  # batch rows per grid step
    b_pad = _round_up(B, bm)
    if b_pad != B:
        x2d = jnp.pad(x2d, ((0, b_pad - B), (0, 0)))
    num_tiles = b_pad // bm

    const = lambda i: (0, 0)                                # weights: VMEM-resident
    weight_specs = [
        pl.BlockSpec((4 * INPUT_SIZE, HALF), const),        # w1q  (28, 256)
        pl.BlockSpec((HALF, HALF), const),                  # w2q  (256, 256)
        pl.BlockSpec((LSTM_IN, 4 * GATE), const),           # wih  (512, 512)
        pl.BlockSpec((2 * HIDDEN, 4 * GATE), const),        # whh  (128, 512)
        pl.BlockSpec((2 * GATE, HEAD_PAD), const),          # head (256, 128)
        pl.BlockSpec((8, 4 * GATE), const),                 # bias slab (8, 512)
    ]

    weight_bytes = sum(int(kp[k].size) * kp[k].dtype.itemsize
                       for k in ("w1q", "w2q", "wih", "whh", "whead", "biases"))
    macs_per_row = (4 * INPUT_SIZE * HALF * 2 + HALF * HALF * 2
                    + HALF * 4 * GATE * 2 + 2 * HIDDEN * 4 * GATE
                    + 2 * GATE * HEAD_PAD)
    cost = pl.CostEstimate(
        flops=int(2 * b_pad * macs_per_row),
        transcendentals=int(b_pad * 1152),
        bytes_accessed=int(weight_bytes + x2d.size * x2d.dtype.itemsize
                           + b_pad * HEAD_PAD * 4),
    )

    out = pl.pallas_call(
        _mrn_kernel,
        out_shape=jax.ShapeDtypeStruct((b_pad, HEAD_PAD), jnp.float32),
        grid=(num_tiles,),
        in_specs=[pl.BlockSpec((bm, L * C), lambda i: (i, 0))] + weight_specs,
        out_specs=pl.BlockSpec((bm, HEAD_PAD), lambda i: (i, 0)),
        compiler_params=pltpu.CompilerParams(
            dimension_semantics=("parallel",)),             # v7x: both TensorCores
        cost_estimate=cost,
    )(x2d, kp["w1q"], kp["w2q"], kp["wih"], kp["whh"], kp["whead"], kp["biases"])

    return out[:B, 0:1], out[:B, 1:2]                       # (predf, preds)


# ----------------------------- params ----------------------------------------

def init_torch_style_params(key):
    """Random params in the original PyTorch layouts / init distributions."""
    ks = jax.random.split(key, 20)
    H4 = 4 * HIDDEN
    s_lstm = 1.0 / (HIDDEN ** 0.5)
    s_conv2 = 1.0 / (CONV_CH ** 0.5)
    u = lambda k, shape, b: jax.random.uniform(k, shape, jnp.float32, -b, b)
    n = lambda k, shape, sd: jax.random.normal(k, shape, jnp.float32) * sd
    return {
        # conv1: kaiming_normal_(fan_out, relu), zero bias (as in the module)
        "conv1_w": n(ks[0], (CONV_CH, INPUT_SIZE), (2.0 / CONV_CH) ** 0.5),
        "conv1_b": jnp.zeros((CONV_CH,), jnp.float32),
        # conv2: PyTorch default Conv1d init
        "conv2_w": u(ks[1], (CONV_CH, CONV_CH), s_conv2),
        "conv2_b": u(ks[2], (CONV_CH,), s_conv2),
        # bilstmf (PyTorch layout: (4H, in) / (4H, H); gate row order i,f,g,o)
        "wih_f": u(ks[3], (H4, LSTM_IN), s_lstm),
        "whh_f": u(ks[4], (H4, HIDDEN), s_lstm),
        "bih_f": u(ks[5], (H4,), s_lstm),
        "bhh_f": u(ks[6], (H4,), s_lstm),
        "wih_b": u(ks[7], (H4, LSTM_IN), s_lstm),
        "whh_b": u(ks[8], (H4, HIDDEN), s_lstm),
        "bih_b": u(ks[9], (H4,), s_lstm),
        "bhh_b": u(ks[10], (H4,), s_lstm),
        # linearf / linears: normal(0, 0.01), zero bias
        "wlf": n(ks[11], (2 * HIDDEN, 2 * HIDDEN), 0.01),
        "blf": jnp.zeros((2 * HIDDEN,), jnp.float32),
        "wls": n(ks[12], (2 * HIDDEN, 2 * HIDDEN), 0.01),
        "bls": jnp.zeros((2 * HIDDEN,), jnp.float32),
        # networks[0] / networks[1]: Linear(128, 1), normal(0, 0.01), zero bias
        "wn0": n(ks[13], (1, 2 * HIDDEN), 0.01),
        "bn0": jnp.zeros((1,), jnp.float32),
        "wn1": n(ks[14], (1, 2 * HIDDEN), 0.01),
        "bn1": jnp.zeros((1,), jnp.float32),
    }


def prepare_kernel_params(pt):
    """Fold PyTorch-layout params into the fused-kernel layout.

    Checkpoint loaders must apply the same folds (4-timestep block-diag conv
    weights, l-major -> channel-major row permutation of the LSTM input
    weights, gate/direction column reorder, linearf/linears x networks fold,
    bias packing) for bit-compatible results.
    """
    L, Cout, H = SEQ_LEN, CONV_CH, HIDDEN
    f32 = jnp.float32

    # conv1/conv2 (kernel_size=1) as 4-timestep block-diagonal matmuls acting
    # on the two 256-lane halves of the l-major feature row.
    eye4 = jnp.eye(L // 2, dtype=f32)
    w1q = jnp.kron(eye4, pt["conv1_w"].T.astype(f32))        # (28, 256)
    w2q = jnp.kron(eye4, pt["conv2_w"].T.astype(f32))        # (256, 256)
    b1q = jnp.tile(pt["conv1_b"].astype(f32), L // 2)        # (256,)
    b2q = jnp.tile(pt["conv2_b"].astype(f32), L // 2)        # (256,)

    # PyTorch feeds channel-major convout.view(B,1,-1) (index c*L + l) into the
    # LSTM; our conv features are l-major (index l*64 + c).  Fold that fixed
    # permutation into the LSTM input-weight rows.
    idx = jnp.arange(L * Cout)
    perm = (idx % Cout) * L + (idx // Cout)                  # kernel row -> PyTorch row

    pt_gate = {"i": slice(0, H), "f": slice(H, 2 * H),
               "g": slice(2 * H, 3 * H), "o": slice(3 * H, 4 * H)}
    order = ("i", "o", "f", "g")     # kernel column order (sigmoid gates first)

    wih_cols, whh_cols, b_cols = [], [], []
    for gname in order:
        s = pt_gate[gname]
        for d in ("f", "b"):         # forward direction, then reverse direction
            wih = pt["wih_" + d].astype(f32)                 # (256, 512)
            whh = pt["whh_" + d].astype(f32)                 # (256, 64)
            b = (pt["bih_" + d] + pt["bhh_" + d]).astype(f32)
            wih_cols.append(wih[s, :].T[perm, :])            # (512, 64)
            blk = jnp.zeros((2 * H, H), f32)                 # block-diag recurrent:
            row0 = 0 if d == "f" else H                      # keeps 128-lane gate slices
            blk = blk.at[row0:row0 + H, :].set(whh[s, :].T)
            whh_cols.append(blk)
            b_cols.append(b[s])
    wih_c = jnp.concatenate(wih_cols, axis=1)                # (512, 512) dense
    whh_c = jnp.concatenate(whh_cols, axis=1)                # (128, 512)
    b_c = jnp.concatenate(b_cols)                            # (512,)

    # Fold linearf/linears through networks[0]/networks[1] (the module applies
    # no nonlinearity in between) into one lane-dense (256, 128) head weight.
    m0 = pt["wlf"].T.astype(f32) @ pt["wn0"].T.astype(f32)   # (128, 1)
    m1 = pt["wls"].T.astype(f32) @ pt["wn1"].T.astype(f32)   # (128, 1)
    whead = jnp.zeros((4 * H, HEAD_PAD), f32)
    whead = whead.at[0:2 * H, 0].set(m0[:, 0])
    whead = whead.at[2 * H:4 * H, 1].set(m1[:, 0])
    hb0 = pt["blf"].astype(f32) @ pt["wn0"].T.astype(f32) + pt["bn0"].astype(f32)
    hb1 = pt["bls"].astype(f32) @ pt["wn1"].T.astype(f32) + pt["bn1"].astype(f32)

    # Pack every bias into one (8, 512) f32 slab -> a single resident buffer.
    biases = jnp.zeros((8, 4 * GATE), f32)
    biases = biases.at[0, 0:4 * Cout].set(b1q)
    biases = biases.at[1, 0:4 * Cout].set(b2q)
    biases = biases.at[2, :].set(b_c)
    biases = biases.at[3, 0].set(hb0[0])
    biases = biases.at[3, 1].set(hb1[0])

    bf16 = jnp.bfloat16
    return {"w1q": w1q.astype(bf16), "w2q": w2q.astype(bf16),
            "wih": wih_c.astype(bf16), "whh": whh_c.astype(bf16),
            "whead": whead.astype(bf16), "biases": biases}


# ----------------------------- demo -------------------------------------------

if __name__ == "__main__":
    key = jax.random.PRNGKey(0)
    kx, kparam = jax.random.split(key)
    B = 72   # the module's batch_size
    x = jax.random.normal(kx, (B, SEQ_LEN, INPUT_SIZE), jnp.float32)

    pt_params = init_torch_style_params(kparam)
    kernel_params = jax.tree_util.tree_map(jax.block_until_ready,
                                           prepare_kernel_params(pt_params))

    fwd = jax.jit(mrn_forward, static_argnames=("block_batch",))

    # Single-tile call (grid = 1, whole batch in one step).
    predf, preds = fwd(x, kernel_params)
    jax.block_until_ready((predf, preds))

    # Multi-tile call (grid = 3 with row padding, weights resident) must match.
    predf2, preds2 = fwd(x, kernel_params, block_batch=32)
    jax.block_until_ready((predf2, preds2))

    assert predf.shape == (B, 1) and preds.shape == (B, 1)
    assert predf.dtype == jnp.float32 and preds.dtype == jnp.float32
    assert bool(jnp.all(jnp.isfinite(predf))) and bool(jnp.all(jnp.isfinite(preds)))
    assert bool(jnp.allclose(predf, predf2, rtol=1e-5, atol=1e-5))
    assert bool(jnp.allclose(preds, preds2, rtol=1e-5, atol=1e-5))
    print("KERNEL_OK")
</pallas_src>

<mosaic_0001>
module attributes {stable_mosaic.version = 11 : i64} {
  func.func @_mrn_kernel(%arg0: i32, %arg1: memref<72x56xbf16, #tpu.memory_space<vmem>>, %arg2: memref<28x256xbf16, #tpu.memory_space<vmem>>, %arg3: memref<256x256xbf16, #tpu.memory_space<vmem>>, %arg4: memref<512x512xbf16, #tpu.memory_space<vmem>>, %arg5: memref<128x512xbf16, #tpu.memory_space<vmem>>, %arg6: memref<256x128xbf16, #tpu.memory_space<vmem>>, %arg7: memref<8x512xf32, #tpu.memory_space<vmem>>, %arg8: memref<72x128xf32, #tpu.memory_space<vmem>>) attributes {dimension_semantics = [#tpu.dimension_semantics<parallel>], iteration_bounds = array<i64: 1>, scalar_prefetch = 0 : i64, scratch_operands = 0 : i64, tpu.core_type = #tpu.core_type<tc>, window_params = [{transform_indices = @transform_0, window_bounds = array<i64: 72, 56>}, {pipeline_mode = #tpu.pipeline_mode<synchronous>, transform_indices = @transform_1, window_bounds = array<i64: 28, 256>}, {pipeline_mode = #tpu.pipeline_mode<synchronous>, transform_indices = @transform_2, window_bounds = array<i64: 256, 256>}, {pipeline_mode = #tpu.pipeline_mode<synchronous>, transform_indices = @transform_3, window_bounds = array<i64: 512, 512>}, {pipeline_mode = #tpu.pipeline_mode<synchronous>, transform_indices = @transform_4, window_bounds = array<i64: 128, 512>}, {pipeline_mode = #tpu.pipeline_mode<synchronous>, transform_indices = @transform_5, window_bounds = array<i64: 256, 128>}, {pipeline_mode = #tpu.pipeline_mode<synchronous>, transform_indices = @transform_6, window_bounds = array<i64: 8, 512>}, {transform_indices = @transform_7, window_bounds = array<i64: 72, 128>}]} {
    %c0 = arith.constant 0 : index
    %c0_0 = arith.constant 0 : index
    %0 = vector.load %arg7[%c0, %c0_0] : memref<8x512xf32, #tpu.memory_space<vmem>>, vector<8x512xf32>
    %1 = vector.extract_strided_slice %0 {offsets = [0, 0], sizes = [1, 256], strides = [1, 1]} : vector<8x512xf32> to vector<1x256xf32>
    %2 = vector.extract_strided_slice %0 {offsets = [1, 0], sizes = [1, 256], strides = [1, 1]} : vector<8x512xf32> to vector<1x256xf32>
    %3 = vector.extract_strided_slice %0 {offsets = [2, 0], sizes = [1, 512], strides = [1, 1]} : vector<8x512xf32> to vector<1x512xf32>
    %4 = vector.extract_strided_slice %0 {offsets = [3, 0], sizes = [1, 128], strides = [1, 1]} : vector<8x512xf32> to vector<1x128xf32>
    %c0_1 = arith.constant 0 : index
    %c0_2 = arith.constant 0 : index
    %5 = vector.load %arg1[%c0_1, %c0_2] : memref<72x56xbf16, #tpu.memory_space<vmem>>, vector<72x56xbf16>
    %c0_3 = arith.constant 0 : index
    %c0_4 = arith.constant 0 : index
    %6 = vector.load %arg2[%c0_3, %c0_4] : memref<28x256xbf16, #tpu.memory_space<vmem>>, vector<28x256xbf16>
    %c0_5 = arith.constant 0 : index
    %c0_6 = arith.constant 0 : index
    %7 = vector.load %arg3[%c0_5, %c0_6] : memref<256x256xbf16, #tpu.memory_space<vmem>>, vector<256x256xbf16>
    %8 = vector.extract_strided_slice %5 {offsets = [0, 0], sizes = [72, 28], strides = [1, 1]} : vector<72x56xbf16> to vector<72x28xbf16>
    %cst = arith.constant dense<0.000000e+00> : vector<72x256xf32>
    %9 = tpu.matmul %8, %6, %cst {dimension_numbers = #tpu.dot_dimension_numbers<[1], [0], [0], [1], [0, 0, 1, 1], [], []>} : vector<72x28xbf16>, vector<28x256xbf16>, vector<72x256xf32> -> vector<72x256xf32>
    %10 = vector.broadcast %1 : vector<1x256xf32> to vector<72x256xf32>
    %11 = arith.addf %9, %10 : vector<72x256xf32>
    %cst_7 = arith.constant 0.000000e+00 : f32
    %12 = vector.broadcast %cst_7 : f32 to vector<72x256xf32>
    %13 = arith.maximumf %11, %12 : vector<72x256xf32>
    %14 = arith.truncf %13 : vector<72x256xf32> to vector<72x256xbf16>
    %cst_8 = arith.constant dense<0.000000e+00> : vector<72x256xf32>
    %15 = tpu.matmul %14, %7, %cst_8 {dimension_numbers = #tpu.dot_dimension_numbers<[1], [0], [0], [1], [0, 0, 1, 1], [], []>} : vector<72x256xbf16>, vector<256x256xbf16>, vector<72x256xf32> -> vector<72x256xf32>
    %16 = vector.broadcast %2 : vector<1x256xf32> to vector<72x256xf32>
    %17 = arith.addf %15, %16 : vector<72x256xf32>
    %cst_9 = arith.constant 0.000000e+00 : f32
    %18 = vector.broadcast %cst_9 : f32 to vector<72x256xf32>
    %19 = arith.maximumf %17, %18 : vector<72x256xf32>
    %20 = arith.truncf %19 : vector<72x256xf32> to vector<72x256xbf16>
    %21 = vector.extract_strided_slice %5 {offsets = [0, 28], sizes = [72, 28], strides = [1, 1]} : vector<72x56xbf16> to vector<72x28xbf16>
    %cst_10 = arith.constant dense<0.000000e+00> : vector<72x256xf32>
    %22 = tpu.matmul %21, %6, %cst_10 {dimension_numbers = #tpu.dot_dimension_numbers<[1], [0], [0], [1], [0, 0, 1, 1], [], []>} : vector<72x28xbf16>, vector<28x256xbf16>, vector<72x256xf32> -> vector<72x256xf32>
    %23 = vector.broadcast %1 : vector<1x256xf32> to vector<72x256xf32>
    %24 = arith.addf %22, %23 : vector<72x256xf32>
    %cst_11 = arith.constant 0.000000e+00 : f32
    %25 = vector.broadcast %cst_11 : f32 to vector<72x256xf32>
    %26 = arith.maximumf %24, %25 : vector<72x256xf32>
    %27 = arith.truncf %26 : vector<72x256xf32> to vector<72x256xbf16>
    %cst_12 = arith.constant dense<0.000000e+00> : vector<72x256xf32>
    %28 = tpu.matmul %27, %7, %cst_12 {dimension_numbers = #tpu.dot_dimension_numbers<[1], [0], [0], [1], [0, 0, 1, 1], [], []>} : vector<72x256xbf16>, vector<256x256xbf16>, vector<72x256xf32> -> vector<72x256xf32>
    %29 = vector.broadcast %2 : vector<1x256xf32> to vector<72x256xf32>
    %30 = arith.addf %28, %29 : vector<72x256xf32>
    %cst_13 = arith.constant 0.000000e+00 : f32
    %31 = vector.broadcast %cst_13 : f32 to vector<72x256xf32>
    %32 = arith.maximumf %30, %31 : vector<72x256xf32>
    %33 = arith.truncf %32 : vector<72x256xf32> to vector<72x256xbf16>
    %c0_14 = arith.constant 0 : index
    %c0_15 = arith.constant 0 : index
    %34 = vector.load %arg4[%c0_14, %c0_15] : memref<512x512xbf16, #tpu.memory_space<vmem>>, vector<256x512xbf16>
    %cst_16 = arith.constant dense<0.000000e+00> : vector<72x512xf32>
    %35 = tpu.matmul %20, %34, %cst_16 {dimension_numbers = #tpu.dot_dimension_numbers<[1], [0], [0], [1], [0, 0, 1, 1], [], []>} : vector<72x256xbf16>, vector<256x512xbf16>, vector<72x512xf32> -> vector<72x512xf32>
    %c256 = arith.constant 256 : index
    %c0_17 = arith.constant 0 : index
    %36 = vector.load %arg4[%c256, %c0_17] : memref<512x512xbf16, #tpu.memory_space<vmem>>, vector<256x512xbf16>
    %cst_18 = arith.constant dense<0.000000e+00> : vector<72x512xf32>
    %37 = tpu.matmul %33, %36, %cst_18 {dimension_numbers = #tpu.dot_dimension_numbers<[1], [0], [0], [1], [0, 0, 1, 1], [], []>} : vector<72x256xbf16>, vector<256x512xbf16>, vector<72x512xf32> -> vector<72x512xf32>
    %38 = arith.addf %35, %37 : vector<72x512xf32>
    %39 = vector.broadcast %3 : vector<1x512xf32> to vector<72x512xf32>
    %40 = arith.addf %38, %39 : vector<72x512xf32>
    %41 = vector.extract_strided_slice %40 {offsets = [0, 0], sizes = [72, 256], strides = [1, 1]} : vector<72x512xf32> to vector<72x256xf32>
    %42 = arith.negf %41 : vector<72x256xf32>
    %43 = math.exp %42 : vector<72x256xf32>
    %cst_19 = arith.constant 1.000000e+00 : f32
    %44 = vector.broadcast %cst_19 : f32 to vector<72x256xf32>
    %45 = arith.addf %44, %43 : vector<72x256xf32>
    %46 = arith.divf %44, %45 : vector<72x256xf32>
    %47 = vector.extract_strided_slice %46 {offsets = [0, 0], sizes = [72, 128], strides = [1, 1]} : vector<72x256xf32> to vector<72x128xf32>
    %48 = vector.extract_strided_slice %46 {offsets = [0, 128], sizes = [72, 128], strides = [1, 1]} : vector<72x256xf32> to vector<72x128xf32>
    %49 = vector.extract_strided_slice %40 {offsets = [0, 384], sizes = [72, 128], strides = [1, 1]} : vector<72x512xf32> to vector<72x128xf32>
    %50 = math.tanh %49 : vector<72x128xf32>
    %51 = arith.mulf %47, %50 : vector<72x128xf32>
    %52 = math.tanh %51 : vector<72x128xf32>
    %53 = arith.mulf %48, %52 : vector<72x128xf32>
    %54 = arith.truncf %53 : vector<72x128xf32> to vector<72x128xbf16>
    %c0_20 = arith.constant 0 : index
    %c0_21 = arith.constant 0 : index
    %55 = vector.load %arg5[%c0_20, %c0_21] : memref<128x512xbf16, #tpu.memory_space<vmem>>, vector<128x512xbf16>
    %cst_22 = arith.constant dense<0.000000e+00> : vector<72x512xf32>
    %56 = tpu.matmul %54, %55, %cst_22 {dimension_numbers = #tpu.dot_dimension_numbers<[1], [0], [0], [1], [0, 0, 1, 1], [], []>} : vector<72x128xbf16>, vector<128x512xbf16>, vector<72x512xf32> -> vector<72x512xf32>
    %57 = arith.addf %40, %56 : vector<72x512xf32>
    %58 = vector.extract_strided_slice %57 {offsets = [0, 0], sizes = [72, 384], strides = [1, 1]} : vector<72x512xf32> to vector<72x384xf32>
    %59 = arith.negf %58 : vector<72x384xf32>
    %60 = math.exp %59 : vector<72x384xf32>
    %cst_23 = arith.constant 1.000000e+00 : f32
    %61 = vector.broadcast %cst_23 : f32 to vector<72x384xf32>
    %62 = arith.addf %61, %60 : vector<72x384xf32>
    %63 = arith.divf %61, %62 : vector<72x384xf32>
    %64 = vector.extract_strided_slice %63 {offsets = [0, 0], sizes = [72, 128], strides = [1, 1]} : vector<72x384xf32> to vector<72x128xf32>
    %65 = vector.extract_strided_slice %63 {offsets = [0, 128], sizes = [72, 128], strides = [1, 1]} : vector<72x384xf32> to vector<72x128xf32>
    %66 = vector.extract_strided_slice %63 {offsets = [0, 256], sizes = [72, 128], strides = [1, 1]} : vector<72x384xf32> to vector<72x128xf32>
    %67 = vector.extract_strided_slice %57 {offsets = [0, 384], sizes = [72, 128], strides = [1, 1]} : vector<72x512xf32> to vector<72x128xf32>
    %68 = math.tanh %67 : vector<72x128xf32>
    %69 = arith.mulf %66, %51 : vector<72x128xf32>
    %70 = arith.mulf %64, %68 : vector<72x128xf32>
    %71 = arith.addf %69, %70 : vector<72x128xf32>
    %72 = math.tanh %71 : vector<72x128xf32>
    %73 = arith.mulf %65, %72 : vector<72x128xf32>
    %74 = tpu.concatenate %53, %73 in 1 : vector<72x128xf32>, vector<72x128xf32> -> vector<72x256xf32>
    %75 = arith.truncf %74 : vector<72x256xf32> to vector<72x256xbf16>
    %c0_24 = arith.constant 0 : index
    %c0_25 = arith.constant 0 : index
    %76 = vector.load %arg6[%c0_24, %c0_25] : memref<256x128xbf16, #tpu.memory_space<vmem>>, vector<256x128xbf16>
    %cst_26 = arith.constant dense<0.000000e+00> : vector<72x128xf32>
    %77 = tpu.matmul %75, %76, %cst_26 {dimension_numbers = #tpu.dot_dimension_numbers<[1], [0], [0], [1], [0, 0, 1, 1], [], []>} : vector<72x256xbf16>, vector<256x128xbf16>, vector<72x128xf32> -> vector<72x128xf32>
    %78 = vector.broadcast %4 : vector<1x128xf32> to vector<72x128xf32>
    %79 = arith.addf %77, %78 : vector<72x128xf32>
    %c0_27 = arith.constant 0 : index
    %c0_28 = arith.constant 0 : index
    %80 = vector.load %arg8[%c0_27, %c0_28] : memref<72x128xf32, #tpu.memory_space<vmem>>, vector<72x128xf32>
    tpu.vector_store %arg8[%c0_27, %c0_28], %79 {strides = array<i32>} : memref<72x128xf32, #tpu.memory_space<vmem>>, vector<72x128xf32>,
    return
  }
  func.func @transform_0(%arg0: i32) -> (i32, i32) {
    %c0_i32 = arith.constant 0 : i32
    %c0_i32_0 = arith.constant 0 : i32
    return %arg0, %c0_i32 : i32, i32
  }
  func.func @transform_1(%arg0: i32) -> (i32, i32) {
    %c0_i32 = arith.constant 0 : i32
    %c0_i32_0 = arith.constant 0 : i32
    %c0_i32_1 = arith.constant 0 : i32
    return %c0_i32, %c0_i32_0 : i32, i32
  }
  func.func @transform_2(%arg0: i32) -> (i32, i32) {
    %c0_i32 = arith.constant 0 : i32
    %c0_i32_0 = arith.constant 0 : i32
    %c0_i32_1 = arith.constant 0 : i32
    return %c0_i32, %c0_i32_0 : i32, i32
  }
  func.func @transform_3(%arg0: i32) -> (i32, i32) {
    %c0_i32 = arith.constant 0 : i32
    %c0_i32_0 = arith.constant 0 : i32
    %c0_i32_1 = arith.constant 0 : i32
    return %c0_i32, %c0_i32_0 : i32, i32
  }
  func.func @transform_4(%arg0: i32) -> (i32, i32) {
    %c0_i32 = arith.constant 0 : i32
    %c0_i32_0 = arith.constant 0 : i32
    %c0_i32_1 = arith.constant 0 : i32
    return %c0_i32, %c0_i32_0 : i32, i32
  }
  func.func @transform_5(%arg0: i32) -> (i32, i32) {
    %c0_i32 = arith.constant 0 : i32
    %c0_i32_0 = arith.constant 0 : i32
    %c0_i32_1 = arith.constant 0 : i32
    return %c0_i32, %c0_i32_0 : i32, i32
  }
  func.func @transform_6(%arg0: i32) -> (i32, i32) {
    %c0_i32 = arith.constant 0 : i32
    %c0_i32_0 = arith.constant 0 : i32
    %c0_i32_1 = arith.constant 0 : i32
    return %c0_i32, %c0_i32_0 : i32, i32
  }
  func.func @transform_7(%arg0: i32) -> (i32, i32) {
    %c0_i32 = arith.constant 0 : i32
    %c0_i32_0 = arith.constant 0 : i32
    return %arg0, %c0_i32 : i32, i32
  }
}

</mosaic_0001>

<bundles_post_ra>
// kernel: mrn_forward.1
= control target key start
LH: loop header
LB: loop body
LE: loop exit
PB: predicated region body
PF: predicated region fallthrough
CT: control target
= control target key end

     0   :  { %12 = vsyncpa [#allocation3], 0  ;;  %s4813_s0 = inlined_call_operand.vmem [shape: bf16[72,56], index: 0, kind: input, shape index: {}]   ;;  %s4814_s1 = inlined_call_operand.hbm [shape: bf16[28,256], index: 1, kind: input, shape index: {}]   ;;  %s4815_s2 = inlined_call_operand.vmem [shape: bf16[256,256], index: 2, kind: input, shape index: {}]   ;;  %s4816_s3 = inlined_call_operand.hbm [shape: bf16[512,512], index: 3, kind: input, shape index: {}]   ;;  %s4817_s4 = inlined_call_operand.hbm [shape: bf16[128,512], index: 4, kind: input, shape index: {}]   ;;  %s4818_s5 = inlined_call_operand.hbm [shape: bf16[256,128], index: 5, kind: input, shape index: {}]   ;;  %s4819_s6 = inlined_call_operand.hbm [shape: f32[8,512], index: 6, kind: input, shape index: {}]   ;;  %s4820_s7 = inlined_call_operand.vmem [shape: f32[72,128], index: 7, kind: output, shape index: {}]  }
   0x1   :  { %13 = vsyncpa [#allocation5], 0 }
   0x2   :  { %14 = vsyncpa [#allocation8], 0  ;;  %s3976_s24 = smov [#allocation4]  }
   0x3   :  { %s36_s25 = sshll.u32 %s3976_s24, 4  ;;  %s37_s25 = int_to_ptr.vmem [resolvable:$true] %s36_s25 }
   0x4   :  { %s3878_s26 = scalar_lea.vmem %s37_s25, 16384  ;;  %p3883_p1 = scmp.lt.s32.totalorder %s37_s25, %s37_s25 }
   0x5   :  { %p3879_p0 = scmp.ne.s32.totalorder %s37_s25, %s3878_s26  ;;  %p3884_p2 = scmp.lt.s32.totalorder %s3878_s26, %s3878_s26 }
   0x7   :  { %p3885_p3 = por %p3884_p2, %p3883_p1 }
   0x9   :  { %p3886_p4 = pnand %p3885_p3, %p3879_p0 }
   0xb   :  { %3889 = shalt.err (!%p3886_p4)
}
   0xc   :  { %s3977_s27 = smov 256   ;;  %s3978_s28 = smov 16  }
   0xd   :  { %42 = dma.hbm_to_vmem [thread:$0]  %s4816_s3, 16384, %s37_s25, [#allocation5], %s3977_s27, %s3977_s27, %s3978_s28  }
   0xe   :  { %s3979_s8 = smov [#allocation7]  }
   0xf   :  { %s60_s9 = sshll.u32 %s3979_s8, 4  ;;  %s61_s9 = int_to_ptr.vmem [resolvable:$true] %s60_s9 }
  0x10   :  { %s3898_s10 = scalar_lea.vmem %s61_s9, 2048  ;;  %p3903_p6 = scmp.lt.s32.totalorder %s61_s9, %s61_s9 }
  0x11   :  { %p3899_p5 = scmp.ne.s32.totalorder %s61_s9, %s3898_s10  ;;  %p3904_p7 = scmp.lt.s32.totalorder %s3898_s10, %s3898_s10 }
  0x13   :  { %p3905_p8 = por %p3904_p7, %p3903_p6 }
  0x15   :  { %p3906_p9 = pnand %p3905_p8, %p3899_p5 }
  0x17   :  { %3909 = shalt.err (!%p3906_p9)
}
  0x18   :  { %s3980_s11 = smov 64   ;;  %s3981_s12 = smov 4  }
  0x19   :  { %66 = dma.hbm_to_vmem [thread:$0]  %s4818_s5, 2048, %s61_s9, [#allocation8], %s3980_s11, %s3980_s11, %s3981_s12  }
  0x1a   :  { %s3982_s15 = smov [#allocation2]  }
  0x1b   :  { %s22_s16 = sshll.u32 %s3982_s15, 4  ;;  %s23_s16 = int_to_ptr.vmem [resolvable:$true] %s22_s16 }
  0x1c   :  { %s3918_s3 = scalar_lea.vmem %s23_s16, 512  ;;  %p3923_p11 = scmp.lt.s32.totalorder %s23_s16, %s23_s16 }
  0x1d   :  { %p3919_p10 = scmp.ne.s32.totalorder %s23_s16, %s3918_s3  ;;  %p3924_p12 = scmp.lt.s32.totalorder %s3918_s3, %s3918_s3 }
  0x1f   :  { %p3925_p13 = por %p3924_p12, %p3923_p11 }
  0x21   :  { %p3926_p0 = pnand %p3925_p13, %p3919_p10 }
  0x23   :  { %3929 = shalt.err (!%p3926_p0)
}
  0x24   :  { %s3983_s17 = smov 128   ;;  %s3984_s18 = smov 8  }
  0x25   :  { %28 = dma.hbm_to_vmem [thread:$0]  %s4814_s1, 512, %s23_s16, [#allocation3], %s3983_s17, %s3983_s17, %s3984_s18  }
  0x26   :  { %s3985_s21 = smov [#allocation6]   ;;  %s3986_s5 = smov [#allocation9]  }
  0x27   :  { %s48_s22 = sshll.u32 %s3985_s21, 4  ;;  %s73_s23 = sshll.u32 %s3986_s5, 4  ;;  %s49_s22 = int_to_ptr.vmem [resolvable:$true] %s48_s22  ;;  %s74_s23 = int_to_ptr.vmem [resolvable:$true] %s73_s23 }
  0x28   :  { %s3938_s24 = scalar_lea.vmem %s49_s22, 4096  ;;  %p3943_p2 = scmp.lt.s32.totalorder %s49_s22, %s49_s22 }
  0x29   :  { %p3939_p1 = scmp.ne.s32.totalorder %s49_s22, %s3938_s24  ;;  %p3944_p3 = scmp.lt.s32.totalorder %s3938_s24, %s3938_s24 }
  0x2b   :  { %p3945_p4 = por %p3944_p3, %p3943_p2 }
  0x2d   :  { %p3946_p5 = pnand %p3945_p4, %p3939_p1 }
  0x2f   :  { %3949 = shalt.err (!%p3946_p5)
}
  0x30   :  { %54 = dma.hbm_to_vmem [thread:$0]  %s4817_s4, 4096, %s49_s22, [#allocation5], %s3977_s27, %s3977_s27, %s3978_s28  }
  0x31   :  { %s3958_s1 = scalar_lea.vmem %s74_s23, 512  ;;  %p3963_p7 = scmp.lt.s32.totalorder %s74_s23, %s74_s23 }
  0x32   :  { %p3959_p6 = scmp.ne.s32.totalorder %s74_s23, %s3958_s1  ;;  %p3964_p8 = scmp.lt.s32.totalorder %s3958_s1, %s3958_s1 }
  0x34   :  { %p3965_p9 = por %p3964_p8, %p3963_p7 }
  0x36   :  { %p3966_p10 = pnand %p3965_p9, %p3959_p6 }
  0x38   :  { %3969 = shalt.err (!%p3966_p10)
}
  0x39   :  { %76 = dma.hbm_to_vmem [thread:$0]  %s4819_s6, 512, %s74_s23, [#allocation8]  }
  0x3a   :  { %3970 = dma.done.wait [#allocation3], 512  }
  0x3b   :  { %3971 = vsyncadd [#allocation3], 4294966784 }
  0x3c   :  { %3972 = dma.done.wait [#allocation5], 20480  }
  0x3d   :  { %3973 = vsyncadd [#allocation5], 4294946816 }
  0x3e   :  { %3974 = dma.done.wait [#allocation8], 2560  }
  0x3f   :  { %3975 = vsyncadd [#allocation8], 4294964736  ;;  %v4821_v0 = vmov 0   ;;  %v3300_v1 = vld [vmem:[%s4813_s0] sm:$0xff]   ;;  %v3301_v2 = vld [vmem:[%s4813_s0 + $0x8] sm:$0xff]   ;;  %s3988_s9 = smov 100   ;;  %v142_v48 = vlaneseq }
  0x40   :  { %246 = vmatprep.mubr.bf16.mxu0 %v4821_v0  ;;  %600 = vrot.lane.b32.xlu0 %v3300_v1, %s3988_s9  ;;  %v3302_v3 = vld [vmem:[%s4813_s0 + $0x10] sm:$0xff]   ;;  %v3303_v4 = vld [vmem:[%s4813_s0 + $0x18] sm:$0xff]   ;;  %v3304_v5 = vld [vmem:[%s4813_s0 + $0x20] ss:$0 sps:$4 sm:$0xff]   ;;  %vm207_vm0 = vcmask 1045504   ;;  %vm191_vm1 = vcmask 228352  }
  0x41   :  { %604 = vrot.lane.b32.xlu1 %v3302_v3, %s3988_s9  ;;  %v3305_v6 = vld [vmem:[#allocation2 + $0x14] ss:$8 sps:$4 sm:$0x3f]   ;;  %v3307_v7 = vld [vmem:[#allocation2 + $0x10] ss:$8 sps:$4 sm:$0x3f]  }
  0x42   :  { %v3308_v8 = vld [vmem:[#allocation2 + $0x4] ss:$8 sps:$4 sm:$0xff]   ;;  %2976 = vmatprep.subr.msk.bf16.mxu0 %vm207_vm0, %v3305_v6  ;;  %v3310_v9 = vld [vmem:[#allocation2] ss:$8 sps:$4 sm:$0xff]   ;;  %v209_v10 = vsel %vm207_vm0, %v3307_v7, 0  ;;  %v4245_v49 = vshrl.u32 %v142_v48, 7 }
  0x43   :  { %227 = vmatpush1.bf16.msra.mxu0 %v209_v10  ;;  %v3311_v11 = vld [vmem:[%s4815_s2 + $0x74] ss:$8 sps:$4 sm:$0xff]   ;;  %v4074_v12 = vld [vmem:[%s4815_s2 + $0x70] ss:$8 sps:$4 sm:$0xff]   ;;  %v4079_v13 = vld [vmem:[%s4815_s2 + $0x64] ss:$8 sps:$4 sm:$0xff]  }
  0x44   :  { %602 = vrot.lane.b32.xlu0 %v3301_v2, %s3988_s9  ;;  %228 = vmatprep.subr.bf16.mxu0 %v3308_v8  ;;  %v4086_v14 = vld [vmem:[%s4815_s2 + $0x60] ss:$8 sps:$4 sm:$0xff]   ;;  %v4093_v15 = vld [vmem:[%s4815_s2 + $0x54] ss:$8 sps:$4 sm:$0xff]   ;;  %v4099_v16 = vld [vmem:[%s4815_s2 + $0x50] ss:$8 sps:$4 sm:$0xff]  }
  0x45   :  { %606 = vrot.lane.b32.xlu1 %v3303_v4, %s3988_s9  ;;  %491 = vmatprep.subr.bf16.mxu1 %v3311_v11  ;;  %v4105_v17 = vld [vmem:[%s4815_s2 + $0x44] ss:$8 sps:$4 sm:$0xff]   ;;  %v4110_v18 = vld [vmem:[%s4815_s2 + $0x40] ss:$8 sps:$4 sm:$0xff]   ;;  %v4115_v19 = vld [vmem:[%s4815_s2 + $0x34] ss:$8 sps:$4 sm:$0xff]  }
  0x46   :  { %492 = vmatpush1.bf16.msra.mxu1 %v4074_v12  ;;  %v4124_v20 = vld [vmem:[%s4815_s2 + $0x30] ss:$8 sps:$4 sm:$0xff]   ;;  %v4129_v21 = vld [vmem:[%s4815_s2 + $0x24] ss:$8 sps:$4 sm:$0xff]   ;;  %v4136_v22 = vld [vmem:[%s4815_s2 + $0x20] ss:$8 sps:$4 sm:$0xff]  }
  0x47   :  { %229 = vmatpush1.bf16.msra.mxu0 %v3310_v9  ;;  %493 = vmatprep.subr.bf16.mxu1 %v4079_v13  ;;  %v4141_v23 = vld [vmem:[%s4815_s2 + $0x14] ss:$8 sps:$4 sm:$0xff]   ;;  %v4150_v24 = vld [vmem:[%s4815_s2 + $0x10] ss:$8 sps:$4 sm:$0xff]   ;;  %v4155_v25 = vld [vmem:[%s4815_s2 + $0x4] ss:$8 sps:$4 sm:$0xff]  }
  0x48   :  { %608 = vrot.lane.b32.xlu0 %v3304_v5, %s3988_s9  ;;  %3014 = vmatprep.subr.msk.bf16.mxu0 %vm207_vm0, %v3305_v6  ;;  %v4162_v26 = vld [vmem:[%s4815_s2] ss:$8 sps:$4 sm:$0xff]   ;;  %v4167_v27 = vld [vmem:[%s4815_s2 + $0xf4] ss:$8 sps:$4 sm:$0xff]   ;;  %v3337_v28 = vld [vmem:[%s4815_s2 + $0xf0] ss:$8 sps:$4 sm:$0xff]  }
  0x49   :  { %v3338_v29 = vld [vmem:[%s4815_s2 + $0xe4] ss:$8 sps:$4 sm:$0xff]   ;;  %v3340_v30 = vld [vmem:[%s4815_s2 + $0xe0] ss:$8 sps:$4 sm:$0xff]   ;;  %v3341_v31 = vld [vmem:[%s4815_s2 + $0xd4] ss:$8 sps:$4 sm:$0xff]  }
  0x4a   :  { %2977 = vmatmul.mubr.msk.bf16.vlgmr.msra.gmra.mxu0 %vm191_vm1, %v3300_v1  ;;  %494 = vmatpush1.bf16.msra.mxu1 %v4086_v14  ;;  %v3343_v32 = vld [vmem:[%s4815_s2 + $0xd0] ss:$8 sps:$4 sm:$0xff]   ;;  %v3344_v33 = vld [vmem:[%s4815_s2 + $0xc4] ss:$8 sps:$4 sm:$0xff]   ;;  %v3346_v34 = vld [vmem:[%s4815_s2 + $0xc0] ss:$8 sps:$4 sm:$0xff]  }
  0x4b   :  { %256 = vmatprep.mubr.bf16.mxu0 %v4821_v0  ;;  %638 = vmatpush1.bf16.msra.mxu0 %v209_v10  ;;  %v3347_v35 = vld [vmem:[%s4815_s2 + $0xb4] ss:$8 sps:$4 sm:$0xff]   ;;  %v3349_v36 = vld [vmem:[%s4815_s2 + $0xb0] ss:$8 sps:$4 sm:$0xff]   ;;  %v3350_v37 = vld [vmem:[%s4815_s2 + $0xa4] ss:$8 sps:$4 sm:$0xff]  }
  0x4c   :  { %639 = vmatprep.subr.bf16.mxu0 %v3308_v8  ;;  %495 = vmatprep.subr.bf16.mxu1 %v4093_v15  ;;  %v3352_v38 = vld [vmem:[%s4815_s2 + $0xa0] ss:$8 sps:$4 sm:$0xff]   ;;  %v3353_v39 = vld [vmem:[%s4815_s2 + $0x94] ss:$8 sps:$4 sm:$0xff]   ;;  %v3355_v40 = vld [vmem:[%s4815_s2 + $0x90] ss:$8 sps:$4 sm:$0xff]  }
  0x4d   :  { %v3356_v41 = vld [vmem:[%s4815_s2 + $0x84] ss:$8 sps:$4 sm:$0xff]   ;;  %v3358_v42 = vld [vmem:[%s4815_s2 + $0x80] ss:$8 sps:$4 sm:$0xff]   ;;  %4831 = vst [vmem:[#allocation13_spill] sm:$0xff] %v4245_v49  ;;  %v144_v50 = vsub.s32 0, %v4245_v49 }
  0x4e   :  { %496 = vmatpush1.bf16.msra.mxu1 %v4099_v16  ;;  %v4248_v51 = vld [vmem:[#allocation9] sm:$0xff]  ;;  %v4250_v52 = vld [vmem:[#allocation9 + $0x8] sm:$0xff] }
  0x4f   :  { %640 = vmatpush1.bf16.msra.mxu0 %v3310_v9  ;;  %497 = vmatprep.subr.bf16.mxu1 %v4105_v17  ;;  %v4253_v53 = vrot.slane %v4248_v51, %v144_v50  ;;  %v4256_v54 = vrot.slane %v4250_v52, %v144_v50 }
  0x50   :  { %734 = vmatprep.subr.bf16.mxu0 %v3311_v11 }
  0x52   :  { %2978 = vmatmul.mubr.msk.bf16.gmra.mxu0 %vm191_vm1, %v3301_v2  ;;  %498 = vmatpush1.bf16.msra.mxu1 %v4110_v18 }
  0x53   :  { %266 = vmatprep.mubr.bf16.mxu0 %v4821_v0  ;;  %499 = vmatprep.subr.bf16.mxu1 %v4115_v19 }
  0x56   :  { %500 = vmatpush1.bf16.msra.mxu1 %v4124_v20 }
  0x57   :  { %501 = vmatprep.subr.bf16.mxu1 %v4129_v21 }
  0x5a   :  { %2979 = vmatmul.mubr.msk.bf16.gmra.mxu0 %vm191_vm1, %v3302_v3  ;;  %502 = vmatpush1.bf16.msra.mxu1 %v4136_v22 }
  0x5b   :  { %276 = vmatprep.mubr.bf16.mxu0 %v4821_v0  ;;  %503 = vmatprep.subr.bf16.mxu1 %v4141_v23 }
  0x5e   :  { %504 = vmatpush1.bf16.msra.mxu1 %v4150_v24 }
  0x5f   :  { %505 = vmatprep.subr.bf16.mxu1 %v4155_v25 }
  0x62   :  { %2980 = vmatmul.mubr.msk.bf16.gmra.mxu0 %vm191_vm1, %v3303_v4  ;;  %506 = vmatpush1.bf16.msra.mxu1 %v4162_v26 }
  0x63   :  { %286 = vmatprep.mubr.bf16.mxu0 %v4821_v0  ;;  %507 = vmatprep.subr.bf16.mxu1 %v4167_v27 }
  0x66   :  { %508 = vmatpush2.bf16.msra.mxu1 %v3337_v28 }
  0x67   :  { %509 = vmatprep.subr.bf16.mxu1 %v3338_v29 }
  0x6a   :  { %2981 = vmatmul.mubr.msk.bf16.gmra.mxu0 %vm191_vm1, %v3304_v5  ;;  %510 = vmatpush2.bf16.msra.mxu1 %v3340_v30 }
  0x6b   :  { %657 = vmatprep.mubr.bf16.mxu0 %v4821_v0  ;;  %511 = vmatprep.subr.bf16.mxu1 %v3341_v31 }
  0x6e   :  { %512 = vmatpush2.bf16.msra.mxu1 %v3343_v32 }
  0x6f   :  { %513 = vmatprep.subr.bf16.mxu1 %v3344_v33 }
  0x72   :  { %514 = vmatpush2.bf16.msra.mxu1 %v3346_v34 }
  0x73   :  { %515 = vmatprep.subr.bf16.mxu1 %v3347_v35 }
  0x76   :  { %516 = vmatpush2.bf16.msra.mxu1 %v3349_v36 }
  0x77   :  { %517 = vmatprep.subr.bf16.mxu1 %v3350_v37 }
  0x7a   :  { %518 = vmatpush2.bf16.msra.mxu1 %v3352_v38 }
  0x7b   :  { %519 = vmatprep.subr.bf16.mxu1 %v3353_v39 }
  0x7e   :  { %520 = vmatpush2.bf16.msra.mxu1 %v3355_v40 }
  0x7f   :  { %521 = vmatprep.subr.bf16.mxu1 %v3356_v41 }
  0x82   :  { %522 = vmatpush2.bf16.msra.mxu1 %v3358_v42 }
  0xb2   :  { %v601_v43 = vpop.permute.xlu0 %600 }
  0xb3   :  { %3015 = vmatmul.mubr.msk.bf16.vlgmr.msra.gmra.mxu0 %vm191_vm1, %v601_v43  ;;  %v605_v45 = vpop.permute.xlu1 %604 }
  0xb4   :  { %667 = vmatprep.mubr.bf16.mxu0 %v4821_v0  ;;  %735 = vmatpush1.bf16.msra.mxu0 %v4074_v12 }
  0xb5   :  { %736 = vmatprep.subr.bf16.mxu0 %v4079_v13 }
  0xb6   :  { %v603_v44 = vpop.permute.xlu0 %602 }
  0xb7   :  { %v607_v46 = vpop.permute.xlu1 %606 }
  0xb8   :  { %737 = vmatpush1.bf16.msra.mxu0 %v4086_v14 }
  0xb9   :  { %738 = vmatprep.subr.bf16.mxu0 %v4093_v15 }
  0xba   :  { %v609_v47 = vpop.permute.xlu0 %608 }
  0xbb   :  { %3016 = vmatmul.mubr.msk.bf16.gmra.mxu0 %vm191_vm1, %v603_v44 }
  0xbc   :  { %677 = vmatprep.mubr.bf16.mxu0 %v4821_v0  ;;  %739 = vmatpush1.bf16.msra.mxu0 %v4099_v16 }
  0xbd   :  { %740 = vmatprep.subr.bf16.mxu0 %v4105_v17 }
  0xc0   :  { %741 = vmatpush1.bf16.msra.mxu0 %v4110_v18 }
  0xc1   :  { %742 = vmatprep.subr.bf16.mxu0 %v4115_v19 }
  0xc3   :  { %3017 = vmatmul.mubr.msk.bf16.gmra.mxu0 %vm191_vm1, %v605_v45 }
  0xc4   :  { %687 = vmatprep.mubr.bf16.mxu0 %v4821_v0  ;;  %743 = vmatpush1.bf16.msra.mxu0 %v4124_v20 }
  0xc5   :  { %744 = vmatprep.subr.bf16.mxu0 %v4129_v21 }
  0xc8   :  { %745 = vmatpush1.bf16.msra.mxu0 %v4136_v22 }
  0xc9   :  { %746 = vmatprep.subr.bf16.mxu0 %v4141_v23 }
  0xcb   :  { %3018 = vmatmul.mubr.msk.bf16.gmra.mxu0 %vm191_vm1, %v607_v46 }
  0xcc   :  { %697 = vmatprep.mubr.bf16.mxu0 %v4821_v0  ;;  %747 = vmatpush1.bf16.msra.mxu0 %v4150_v24 }
  0xcd   :  { %748 = vmatprep.subr.bf16.mxu0 %v4155_v25 }
  0xd0   :  { %749 = vmatpush1.bf16.msra.mxu0 %v4162_v26 }
  0xd1   :  { %750 = vmatprep.subr.bf16.mxu0 %v4167_v27 }
  0xd3   :  { %3019 = vmatmul.mubr.msk.bf16.gmra.mxu0 %vm191_vm1, %v609_v47 }
  0xd4   :  { %751 = vmatpush2.bf16.msra.mxu0 %v3337_v28 }
  0xd5   :  { %752 = vmatprep.subr.bf16.mxu0 %v3338_v29 }
  0xd8   :  { %753 = vmatpush2.bf16.msra.mxu0 %v3340_v30 }
  0xd9   :  { %754 = vmatprep.subr.bf16.mxu0 %v3341_v31 }
  0xdc   :  { %755 = vmatpush2.bf16.msra.mxu0 %v3343_v32 }
  0xdd   :  { %756 = vmatprep.subr.bf16.mxu0 %v3344_v33 }
  0xe0   :  { %757 = vmatpush2.bf16.msra.mxu0 %v3346_v34 }
  0xe1   :  { %758 = vmatprep.subr.bf16.mxu0 %v3347_v35 }
  0xe4   :  { %759 = vmatpush2.bf16.msra.mxu0 %v3349_v36 }
  0xe5   :  { %760 = vmatprep.subr.bf16.mxu0 %v3350_v37 }
  0xe8   :  { %761 = vmatpush2.bf16.msra.mxu0 %v3352_v38 }
  0xe9   :  { %762 = vmatprep.subr.bf16.mxu0 %v3353_v39 }
  0xec   :  { %763 = vmatpush2.bf16.msra.mxu0 %v3355_v40 }
  0xed   :  { %764 = vmatprep.subr.bf16.mxu0 %v3356_v41 }
  0xf0   :  { %765 = vmatpush2.bf16.msra.mxu0 %v3358_v42 }
 0x10a   :  { %v248_v55 = vpop.f32.mrf.mxu0 }
 0x10b   :  { %v249_v56 = vadd.f32 %v248_v55, %v4253_v53 }
 0x10c   :  { %v250_v57 = vpop.f32.mrf.mxu0 }
 0x10d   :  { %v251_v58 = vadd.f32 %v250_v57, %v4256_v54  ;;  %v295_v61 = vmax.f32 %v249_v56, 0.0 }
 0x10e   :  { %v252_v59 = vpop.f32.mrf.mxu0 }
 0x10f   :  { %v253_v60 = vadd.f32 %v252_v59, %v4253_v53  ;;  %v296_v63 = vmax.f32 %v251_v58, 0.0 }
 0x110   :  { %v254_v62 = vpop.f32.mrf.mxu0 }
 0x111   :  { %v297_v1 = vmax.f32 %v253_v60, 0.0  ;;  %v255_v2 = vadd.f32 %v254_v62, %v4256_v54 }
 0x112   :  { %v258_v3 = vpop.f32.mrf.mxu0 }
 0x113   :  { %v298_v4 = vmax.f32 %v255_v2, 0.0  ;;  %v313_v5 = vpack.c.bf16 %v297_v1, %v295_v61  ;;  %v259_v6 = vadd.f32 %v258_v3, %v4253_v53  ;;  %v3361_v1 = vld [vmem:[#allocation4 + $0x2e4] ss:$16 sps:$4 sm:$0xff]   ;;  %v3364_v2 = vld [vmem:[#allocation4 + $0x2ec] ss:$16 sps:$4 sm:$0xff]  }
 0x114   :  { %v260_v7 = vpop.f32.mrf.mxu0  ;;  %1291 = vmatprep.subr.bf16.mxu1 %v3361_v1  ;;  %1372 = vmatprep.subr.bf16.mxu0 %v3364_v2  ;;  %v3365_v3 = vld [vmem:[#allocation4 + $0x2c0] ss:$16 sps:$4 sm:$0xff]   ;;  %v3382_v1 = vld [vmem:[#allocation4 + $0x28c] ss:$16 sps:$4 sm:$0xff]   ;;  %v3421_v2 = vld [vmem:[#allocation4 + $0x3a4] ss:$16 sps:$4 sm:$0xff]  }
 0x115   :  { %v261_v8 = vadd.f32 %v260_v7, %v4256_v54  ;;  %v314_v9 = vpack.c.bf16 %v298_v4, %v296_v63  ;;  %v299_v12 = vmax.f32 %v259_v6, 0.0  ;;  %v3359_v63 = vld [vmem:[#allocation4 + $0x2e0] ss:$16 sps:$4 sm:$0xff]   ;;  %v3367_v4 = vld [vmem:[#allocation4 + $0x2c4] ss:$16 sps:$4 sm:$0xff]  }
 0x116   :  { %v262_v10 = vpop.f32.mrf.mxu0  ;;  %v3371_v6 = vld [vmem:[#allocation4 + $0x2a0] ss:$16 sps:$4 sm:$0xff]  }
 0x117   :  { %v263_v11 = vadd.f32 %v262_v10, %v4253_v53  ;;  %523 = vmatprep.mubr.bf16.mxu1 %v314_v9  ;;  %v300_v14 = vmax.f32 %v261_v8, 0.0  ;;  %v3377_v7 = vld [vmem:[#allocation4 + $0x280] ss:$16 sps:$4 sm:$0xff]   ;;  %v3379_v8 = vld [vmem:[#allocation4 + $0x284] ss:$16 sps:$4 sm:$0xff]  }
 0x118   :  { %v264_v13 = vpop.f32.mrf.mxu0  ;;  %524 = vmatmul.mubr.bf16.vlgmr.msra.gmra.mxu1 %v313_v5  ;;  %v3373_v5 = vld [vmem:[#allocation4 + $0x2a4] ss:$16 sps:$4 sm:$0xff]   ;;  %v3383_v10 = vld [vmem:[#allocation4 + $0x260] ss:$16 sps:$4 sm:$0xff]  }
 0x119   :  { %v301_v15 = vmax.f32 %v263_v11, 0.0  ;;  %v265_v16 = vadd.f32 %v264_v13, %v4256_v54  ;;  %1292 = vmatpush1.bf16.msra.mxu1 %v3359_v63  ;;  %v3385_v9 = vld [vmem:[#allocation4 + $0x264] ss:$16 sps:$4 sm:$0xff]  }
 0x11a   :  { %v268_v17 = vpop.f32.mrf.mxu0  ;;  %1293 = vmatprep.subr.bf16.mxu1 %v3367_v4 }
 0x11b   :  { %v302_v18 = vmax.f32 %v265_v16, 0.0  ;;  %v315_v19 = vpack.c.bf16 %v301_v15, %v299_v12  ;;  %v269_v20 = vadd.f32 %v268_v17, %v4253_v53  ;;  %v3391_v15 = vld [vmem:[#allocation4 + $0x244] ss:$16 sps:$4 sm:$0xff]  }
 0x11c   :  { %v270_v21 = vpop.f32.mrf.mxu0 }
 0x11d   :  { %v271_v22 = vadd.f32 %v270_v21, %v4256_v54  ;;  %v316_v23 = vpack.c.bf16 %v302_v18, %v300_v14  ;;  %v303_v26 = vmax.f32 %v269_v20, 0.0  ;;  %1294 = vmatpush1.bf16.msra.mxu1 %v3365_v3  ;;  %v3389_v14 = vld [vmem:[#allocation4 + $0x240] ss:$16 sps:$4 sm:$0xff]   ;;  %v3397_v20 = vld [vmem:[#allocation4 + $0x224] ss:$16 sps:$4 sm:$0xff]  }
 0x11e   :  { %v272_v24 = vpop.f32.mrf.mxu0  ;;  %1295 = vmatprep.subr.bf16.mxu1 %v3373_v5 }
 0x11f   :  { %v273_v25 = vadd.f32 %v272_v24, %v4253_v53  ;;  %533 = vmatprep.mubr.bf16.mxu1 %v316_v23  ;;  %v304_v28 = vmax.f32 %v271_v22, 0.0  ;;  %v3395_v22 = vld [vmem:[#allocation4 + $0x220] ss:$16 sps:$4 sm:$0xff]  }
 0x120   :  { %v274_v27 = vpop.f32.mrf.mxu0  ;;  %534 = vmatmul.mubr.bf16.gmra.mxu1 %v315_v19 }
 0x121   :  { %v305_v29 = vmax.f32 %v273_v25, 0.0  ;;  %v275_v30 = vadd.f32 %v274_v27, %v4256_v54  ;;  %1296 = vmatpush1.bf16.msra.mxu1 %v3371_v6 }
 0x122   :  { %v278_v31 = vpop.f32.mrf.mxu0  ;;  %1297 = vmatprep.subr.bf16.mxu1 %v3379_v8 }
 0x123   :  { %v306_v32 = vmax.f32 %v275_v30, 0.0  ;;  %v317_v33 = vpack.c.bf16 %v305_v29, %v303_v26  ;;  %v279_v34 = vadd.f32 %v278_v31, %v4253_v53 }
 0x124   :  { %v280_v35 = vpop.f32.mrf.mxu0 }
 0x125   :  { %v318_v36 = vpack.c.bf16 %v306_v32, %v304_v28  ;;  %v281_v37 = vadd.f32 %v280_v35, %v4256_v54  ;;  %v307_v40 = vmax.f32 %v279_v34, 0.0  ;;  %1298 = vmatpush1.bf16.msra.mxu1 %v3377_v7  ;;  %v3362_v32 = vld [vmem:[#allocation4 + $0x2e8] ss:$16 sps:$4 sm:$0xff]   ;;  %v3370_v35 = vld [vmem:[#allocation4 + $0x2cc] ss:$16 sps:$4 sm:$0xff]  }
 0x126   :  { %v282_v38 = vpop.f32.mrf.mxu0  ;;  %1299 = vmatprep.subr.bf16.mxu1 %v3385_v9  ;;  %v3380_v9 = vld [vmem:[#allocation4 + $0x288] ss:$16 sps:$4 sm:$0xff]  }
 0x127   :  { %v283_v39 = vadd.f32 %v282_v38, %v4253_v53  ;;  %543 = vmatprep.mubr.bf16.mxu1 %v318_v36  ;;  %v308_v42 = vmax.f32 %v281_v37, 0.0  ;;  %v3401_v36 = vld [vmem:[#allocation4 + $0x200] ss:$16 sps:$4 sm:$0xff]   ;;  %v3403_v37 = vld [vmem:[#allocation4 + $0x204] ss:$16 sps:$4 sm:$0xff]  }
 0x128   :  { %v284_v41 = vpop.f32.mrf.mxu0  ;;  %544 = vmatmul.mubr.bf16.gmra.mxu1 %v317_v33 }
 0x129   :  { %v309_v43 = vmax.f32 %v283_v39, 0.0  ;;  %v285_v44 = vadd.f32 %v284_v41, %v4256_v54  ;;  %1300 = vmatpush1.bf16.msra.mxu1 %v3383_v10  ;;  %v3419_v10 = vld [vmem:[#allocation4 + $0x3a0] ss:$16 sps:$4 sm:$0xff]  }
 0x12a   :  { %v288_v45 = vpop.f32.mrf.mxu0  ;;  %1301 = vmatprep.subr.bf16.mxu1 %v3391_v15 }
 0x12b   :  { %v310_v46 = vmax.f32 %v285_v44, 0.0  ;;  %v319_v47 = vpack.c.bf16 %v309_v43, %v307_v40  ;;  %v289_v48 = vadd.f32 %v288_v45, %v4253_v53  ;;  %v3368_v44 = vld [vmem:[#allocation4 + $0x2c8] ss:$16 sps:$4 sm:$0xff]  }
 0x12c   :  { %v290_v50 = vpop.f32.mrf.mxu0 }
 0x12d   :  { %v320_v55 = vpack.c.bf16 %v310_v46, %v308_v42  ;;  %v291_v56 = vadd.f32 %v290_v50, %v4256_v54  ;;  %v311_v59 = vmax.f32 %v289_v48, 0.0  ;;  %1302 = vmatpush1.bf16.msra.mxu1 %v3389_v14  ;;  %v3376_v46 = vld [vmem:[#allocation4 + $0x2ac] ss:$16 sps:$4 sm:$0xff]   ;;  %v3409_v48 = vld [vmem:[#allocation4 + $0x3e4] ss:$16 sps:$4 sm:$0xff]  }
 0x12e   :  { %v292_v57 = vpop.f32.mrf.mxu0  ;;  %1303 = vmatprep.subr.bf16.mxu1 %v3397_v20  ;;  %v3386_v20 = vld [vmem:[#allocation4 + $0x268] ss:$16 sps:$4 sm:$0xff]  }
 0x12f   :  { %553 = vmatprep.mubr.bf16.mxu1 %v320_v55  ;;  %v312_v58 = vmax.f32 %v291_v56, 0.0  ;;  %v321_v62 = vpack.c.bf16 %v311_v59, %v311_v59 }
 0x130   :  { %554 = vmatmul.mubr.bf16.gmra.mxu1 %v319_v47  ;;  %v293_v60 = vpop.f32.mrf.mxu0  ;;  %v3407_v47 = vld [vmem:[#allocation4 + $0x3e0] ss:$16 sps:$4 sm:$0xff]  }
 0x131   :  { %v322_v61 = vpack.c.bf16 %v312_v58, %v312_v58  ;;  %1304 = vmatpush1.bf16.msra.mxu1 %v3395_v22  ;;  %v3415_v58 = vld [vmem:[#allocation4 + $0x3c4] ss:$16 sps:$4 sm:$0xff]  }
 0x132   :  { %1305 = vmatprep.subr.bf16.mxu1 %v3403_v37 }
 0x133   :  { %563 = vmatprep.mubr.bf16.mxu1 %v322_v61  ;;  %v3374_v61 = vld [vmem:[#allocation4 + $0x2a8] ss:$16 sps:$4 sm:$0xff]  }
 0x135   :  { %1306 = vmatpush1.bf16.msra.mxu1 %v3401_v36 }
 0x136   :  { %1307 = vmatprep.subr.bf16.mxu1 %v3409_v48  ;;  %v3404_v48 = vld [vmem:[#allocation4 + $0x208] ss:$16 sps:$4 sm:$0xff]  }
 0x138   :  { %564 = vmatmul.mubr.bf16.gmra.mxu1 %v321_v62  ;;  %v3413_v62 = vld [vmem:[#allocation4 + $0x3c0] ss:$16 sps:$4 sm:$0xff]  }
 0x139   :  { %1308 = vmatpush2.bf16.msra.mxu1 %v3407_v47 }
 0x13a   :  { %1309 = vmatprep.subr.bf16.mxu1 %v3415_v58  ;;  %v3422_v58 = vld [vmem:[#allocation4 + $0x3a8] ss:$16 sps:$4 sm:$0xff]  }
 0x13d   :  { %1310 = vmatpush2.bf16.msra.mxu1 %v3413_v62  ;;  %v3434_v62 = vld [vmem:[#allocation4 + $0x368] ss:$16 sps:$4 sm:$0xff]  }
 0x13e   :  { %1311 = vmatprep.subr.bf16.mxu1 %v3421_v2  ;;  %v3437_v2 = vld [vmem:[#allocation4 + $0x340] ss:$16 sps:$4 sm:$0xff]  }
 0x141   :  { %1312 = vmatpush2.bf16.msra.mxu1 %v3419_v10  ;;  %v3449_v10 = vld [vmem:[#allocation4 + $0x300] ss:$16 sps:$4 sm:$0xff]  }
 0x173   :  { %v659_v11 = vpop.f32.mrf.mxu0 }
 0x174   :  { %v660_v18 = vadd.f32 %v659_v11, %v4253_v53 }
 0x175   :  { %v661_v12 = vpop.f32.mrf.mxu0 }
 0x176   :  { %v662_v16 = vadd.f32 %v661_v12, %v4256_v54  ;;  %v706_v27 = vmax.f32 %v660_v18, 0.0  ;;  %v3388_v12 = vld [vmem:[#allocation4 + $0x26c] ss:$16 sps:$4 sm:$0xff]  }
 0x177   :  { %v663_v13 = vpop.f32.mrf.mxu0 }
 0x178   :  { %v664_v17 = vadd.f32 %v663_v13, %v4253_v53  ;;  %v707_v25 = vmax.f32 %v662_v16, 0.0  ;;  %v3427_v13 = vld [vmem:[#allocation4 + $0x384] ss:$16 sps:$4 sm:$0xff]  }
 0x179   :  { %v665_v19 = vpop.f32.mrf.mxu0  ;;  %1313 = vmatprep.subr.bf16.mxu1 %v3427_v13  ;;  %v3460_v13 = vld [vmem:[#allocation4 + $0xec] ss:$16 sps:$4 sm:$0xff]  }
 0x17a   :  { %v666_v21 = vadd.f32 %v665_v19, %v4256_v54  ;;  %v708_v23 = vmax.f32 %v664_v17, 0.0 }
 0x17b   :  { %v669_v24 = vpop.f32.mrf.mxu0 }
 0x17c   :  { %v709_v26 = vmax.f32 %v666_v21, 0.0  ;;  %v670_v28 = vadd.f32 %v669_v24, %v4253_v53  ;;  %v724_v33 = vpack.c.bf16 %v708_v23, %v706_v27  ;;  %v3425_v21 = vld [vmem:[#allocation4 + $0x380] ss:$16 sps:$4 sm:$0xff]   ;;  %v3394_v23 = vld [vmem:[#allocation4 + $0x24c] ss:$16 sps:$4 sm:$0xff]  }
 0x17d   :  { %v671_v29 = vpop.f32.mrf.mxu0  ;;  %v3433_v24 = vld [vmem:[#allocation4 + $0x364] ss:$16 sps:$4 sm:$0xff]   ;;  %1314 = vmatpush2.bf16.msra.mxu1 %v3425_v21 }
 0x17e   :  { %v725_v30 = vpack.c.bf16 %v709_v26, %v707_v25  ;;  %v672_v31 = vadd.f32 %v671_v29, %v4256_v54  ;;  %v710_v39 = vmax.f32 %v670_v28, 0.0  ;;  %1315 = vmatprep.subr.bf16.mxu1 %v3433_v24 }
 0x17f   :  { %v673_v34 = vpop.f32.mrf.mxu0 }
 0x180   :  { %v674_v38 = vadd.f32 %v673_v34, %v4253_v53  ;;  %766 = vmatprep.mubr.bf16.mxu0 %v725_v30  ;;  %v711_v41 = vmax.f32 %v672_v31, 0.0  ;;  %v3392_v31 = vld [vmem:[#allocation4 + $0x248] ss:$16 sps:$4 sm:$0xff]   ;;  %v3400_v34 = vld [vmem:[#allocation4 + $0x22c] ss:$16 sps:$4 sm:$0xff]  }
 0x181   :  { %v675_v40 = vpop.f32.mrf.mxu0  ;;  %767 = vmatmul.mubr.bf16.vlgmr.msra.gmra.mxu0 %v724_v33 }
 0x182   :  { %v712_v42 = vmax.f32 %v674_v38, 0.0  ;;  %v676_v43 = vadd.f32 %v675_v40, %v4256_v54  ;;  %1373 = vmatpush1.bf16.msra.mxu0 %v3362_v32  ;;  %v3431_v32 = vld [vmem:[#allocation4 + $0x360] ss:$16 sps:$4 sm:$0xff]  }
 0x183   :  { %v679_v45 = vpop.f32.mrf.mxu0  ;;  %1374 = vmatprep.subr.bf16.mxu0 %v3370_v35  ;;  %1316 = vmatpush2.bf16.msra.mxu1 %v3431_v32 }
 0x184   :  { %v713_v50 = vmax.f32 %v676_v43, 0.0  ;;  %v726_v55 = vpack.c.bf16 %v712_v42, %v710_v39  ;;  %v680_v56 = vadd.f32 %v679_v45, %v4253_v53  ;;  %v3406_v43 = vld [vmem:[#allocation4 + $0x20c] ss:$16 sps:$4 sm:$0xff]  }
 0x185   :  { %v681_v57 = vpop.f32.mrf.mxu0 }
 0x186   :  { %v727_v59 = vpack.c.bf16 %v713_v50, %v711_v41  ;;  %v682_v60 = vadd.f32 %v681_v57, %v4256_v54  ;;  %1375 = vmatpush1.bf16.msra.mxu0 %v3368_v44  ;;  %v714_v4 = vmax.f32 %v680_v56, 0.0  ;;  %v3398_v41 = vld [vmem:[#allocation4 + $0x228] ss:$16 sps:$4 sm:$0xff]   ;;  %v3424_v57 = vld [vmem:[#allocation4 + $0x3ac] ss:$16 sps:$4 sm:$0xff]  }
 0x187   :  { %v683_v63 = vpop.f32.mrf.mxu0  ;;  %1376 = vmatprep.subr.bf16.mxu0 %v3376_v46  ;;  %v3416_v56 = vld [vmem:[#allocation4 + $0x3c8] ss:$16 sps:$4 sm:$0xff]  }
 0x188   :  { %v684_v3 = vadd.f32 %v683_v63, %v4253_v53  ;;  %776 = vmatprep.mubr.bf16.mxu0 %v727_v59  ;;  %v715_v6 = vmax.f32 %v682_v60, 0.0  ;;  %v3430_v59 = vld [vmem:[#allocation4 + $0x38c] ss:$16 sps:$4 sm:$0xff]   ;;  %v3428_v60 = vld [vmem:[#allocation4 + $0x388] ss:$16 sps:$4 sm:$0xff]  }
 0x189   :  { %v685_v5 = vpop.f32.mrf.mxu0  ;;  %777 = vmatmul.mubr.bf16.gmra.mxu0 %v726_v55  ;;  %v3418_v55 = vld [vmem:[#allocation4 + $0x3cc] ss:$16 sps:$4 sm:$0xff]   ;;  %v3439_v63 = vld [vmem:[#allocation4 + $0x344] ss:$16 sps:$4 sm:$0xff]  }
 0x18a   :  { %v716_v7 = vmax.f32 %v684_v3, 0.0  ;;  %v686_v8 = vadd.f32 %v685_v5, %v4256_v54  ;;  %1377 = vmatpush1.bf16.msra.mxu0 %v3374_v61  ;;  %v3436_v61 = vld [vmem:[#allocation4 + $0x36c] ss:$16 sps:$4 sm:$0xff]   ;;  %v3440_v3 = vld [vmem:[#allocation4 + $0x348] ss:$16 sps:$4 sm:$0xff]   ;;  %1317 = vmatprep.subr.bf16.mxu1 %v3439_v63 }
 0x18b   :  { %v689_v11 = vpop.f32.mrf.mxu0  ;;  %1378 = vmatprep.subr.bf16.mxu0 %v3382_v1  ;;  %v3442_v1 = vld [vmem:[#allocation4 + $0x34c] ss:$16 sps:$4 sm:$0xff]   ;;  %1318 = vmatpush2.bf16.msra.mxu1 %v3437_v2 }
 0x18c   :  { %v717_v14 = vmax.f32 %v686_v8, 0.0  ;;  %v728_v15 = vpack.c.bf16 %v716_v7, %v714_v4  ;;  %v690_v16 = vadd.f32 %v689_v11, %v4253_v53  ;;  %v3445_v4 = vld [vmem:[#allocation4 + $0x324] ss:$16 sps:$4 sm:$0xff]   ;;  %v3448_v5 = vld [vmem:[#allocation4 + $0x32c] ss:$16 sps:$4 sm:$0xff]  }
 0x18d   :  { %v691_v17 = vpop.f32.mrf.mxu0  ;;  %v3446_v7 = vld [vmem:[#allocation4 + $0x328] ss:$16 sps:$4 sm:$0xff]   ;;  %1319 = vmatprep.subr.bf16.mxu1 %v3445_v4  ;;  %v3451_v8 = vld [vmem:[#allocation4 + $0x304] ss:$16 sps:$4 sm:$0xff]  }
 0x18e   :  { %v729_v18 = vpack.c.bf16 %v717_v14, %v715_v6  ;;  %v692_v19 = vadd.f32 %v691_v17, %v4256_v54  ;;  %1379 = vmatpush1.bf16.msra.mxu0 %v3380_v9  ;;  %v718_v26 = vmax.f32 %v690_v16, 0.0  ;;  %v3443_v6 = vld [vmem:[#allocation4 + $0x320] ss:$16 sps:$4 sm:$0xff]   ;;  %v3454_v9 = vld [vmem:[#allocation4 + $0x30c] ss:$16 sps:$4 sm:$0xff]   ;;  %v325_v14 = vsub.s32 1, %v4245_v49 }
 0x18f   :  { %v693_v22 = vpop.f32.mrf.mxu0  ;;  %1380 = vmatprep.subr.bf16.mxu0 %v3388_v12  ;;  %1320 = vmatpush2.bf16.msra.mxu1 %v3443_v6  ;;  %v3452_v11 = vld [vmem:[#allocation4 + $0x308] ss:$16 sps:$4 sm:$0xff]   ;;  %v3457_v12 = vld [vmem:[#allocation4 + $0xe4] ss:$16 sps:$4 sm:$0xff]  }
 0x190   :  { %v694_v25 = vadd.f32 %v693_v22, %v4253_v53  ;;  %786 = vmatprep.mubr.bf16.mxu0 %v729_v18  ;;  %v719_v28 = vmax.f32 %v692_v19, 0.0  ;;  %1321 = vmatprep.subr.bf16.mxu1 %v3451_v8  ;;  %v4299_v16 = vrot.slane %v4250_v52, %v325_v14 }
 0x191   :  { %v695_v27 = vpop.f32.mrf.mxu0  ;;  %787 = vmatmul.mubr.bf16.gmra.mxu0 %v728_v15  ;;  %v4296_v15 = vrot.slane %v4248_v51, %v325_v14 }
 0x192   :  { %v720_v29 = vmax.f32 %v694_v25, 0.0  ;;  %v696_v30 = vadd.f32 %v695_v27, %v4256_v54  ;;  %1381 = vmatpush1.bf16.msra.mxu0 %v3386_v20 }
 0x193   :  { %v699_v33 = vpop.f32.mrf.mxu0  ;;  %1382 = vmatprep.subr.bf16.mxu0 %v3394_v23  ;;  %1322 = vmatpush2.bf16.msra.mxu1 %v3449_v10 }
 0x194   :  { %v721_v35 = vmax.f32 %v696_v30, 0.0  ;;  %v730_v36 = vpack.c.bf16 %v720_v29, %v718_v26  ;;  %v700_v37 = vadd.f32 %v699_v33, %v4253_v53  ;;  %v3412_v53 = vld [vmem:[#allocation4 + $0x3ec] ss:$16 sps:$4 sm:$0xff]   ;;  %1773 = vmatprep.subr.bf16.mxu1 %v3457_v12 }
 0x195   :  { %v701_v38 = vpop.f32.mrf.mxu0 }
 0x196   :  { %v731_v39 = vpack.c.bf16 %v721_v35, %v719_v28  ;;  %v702_v40 = vadd.f32 %v701_v38, %v4256_v54  ;;  %1383 = vmatpush1.bf16.msra.mxu0 %v3392_v31  ;;  %v722_v45 = vmax.f32 %v700_v37, 0.0  ;;  %v3410_v54 = vld [vmem:[#allocation4 + $0x3e8] ss:$16 sps:$4 sm:$0xff]  }
 0x197   :  { %v703_v42 = vpop.f32.mrf.mxu0  ;;  %1384 = vmatprep.subr.bf16.mxu0 %v3400_v34 }
 0x198   :  { %796 = vmatprep.mubr.bf16.mxu0 %v731_v39  ;;  %v723_v44 = vmax.f32 %v702_v40, 0.0  ;;  %v732_v50 = vpack.c.bf16 %v722_v45, %v722_v45 }
 0x199   :  { %797 = vmatmul.mubr.bf16.gmra.mxu0 %v730_v36  ;;  %v704_v46 = vpop.f32.mrf.mxu0 }
 0x19a   :  { %v733_v47 = vpack.c.bf16 %v723_v44, %v723_v44  ;;  %1385 = vmatpush1.bf16.msra.mxu0 %v3398_v41 }
 0x19b   :  { %1386 = vmatprep.subr.bf16.mxu0 %v3406_v43 }
 0x19c   :  { %806 = vmatprep.mubr.bf16.mxu0 %v733_v47 }
 0x19e   :  { %1387 = vmatpush1.bf16.msra.mxu0 %v3404_v48 }
 0x19f   :  { %1388 = vmatprep.subr.bf16.mxu0 %v3412_v53 }
 0x1a1   :  { %807 = vmatmul.mubr.bf16.gmra.mxu0 %v732_v50 }
 0x1a2   :  { %1389 = vmatpush2.bf16.msra.mxu0 %v3410_v54 }
 0x1a3   :  { %1390 = vmatprep.subr.bf16.mxu0 %v3418_v55 }
 0x1a6   :  { %1391 = vmatpush2.bf16.msra.mxu0 %v3416_v56 }
 0x1a7   :  { %1392 = vmatprep.subr.bf16.mxu0 %v3424_v57 }
 0x1aa   :  { %1393 = vmatpush2.bf16.msra.mxu0 %v3422_v58 }
 0x1ab   :  { %1394 = vmatprep.subr.bf16.mxu0 %v3430_v59 }
 0x1ae   :  { %1395 = vmatpush2.bf16.msra.mxu0 %v3428_v60 }
 0x1af   :  { %1396 = vmatprep.subr.bf16.mxu0 %v3436_v61 }
 0x1b2   :  { %1397 = vmatpush2.bf16.msra.mxu0 %v3434_v62 }
 0x1b3   :  { %1398 = vmatprep.subr.bf16.mxu0 %v3442_v1 }
 0x1b6   :  { %1399 = vmatpush2.bf16.msra.mxu0 %v3440_v3 }
 0x1b7   :  { %1400 = vmatprep.subr.bf16.mxu0 %v3448_v5 }
 0x1ba   :  { %1401 = vmatpush2.bf16.msra.mxu0 %v3446_v7 }
 0x1bb   :  { %1402 = vmatprep.subr.bf16.mxu0 %v3454_v9 }
 0x1be   :  { %1403 = vmatpush2.bf16.msra.mxu0 %v3452_v11 }
 0x1bf   :  { %1854 = vmatprep.subr.bf16.mxu0 %v3460_v13 }
 0x1d8   :  { %v525_v17 = vpop.f32.mrf.mxu1 }
 0x1d9   :  { %v526_v18 = vadd.f32 %v525_v17, %v4296_v15 }
 0x1da   :  { %v527_v19 = vpop.f32.mrf.mxu1 }
 0x1db   :  { %v528_v20 = vadd.f32 %v527_v19, %v4299_v16  ;;  %v572_v22 = vmax.f32 %v526_v18, 0.0 }
 0x1dc   :  { %v529_v21 = vpop.f32.mrf.mxu1 }
 0x1dd   :  { %v530_v23 = vadd.f32 %v529_v21, %v4296_v15  ;;  %v573_v25 = vmax.f32 %v528_v20, 0.0 }
 0x1de   :  { %v531_v24 = vpop.f32.mrf.mxu1 }
 0x1df   :  { %v574_v26 = vmax.f32 %v530_v23, 0.0  ;;  %v532_v27 = vadd.f32 %v531_v24, %v4299_v16 }
 0x1e0   :  { %v535_v51 = vpop.f32.mrf.mxu1 }
 0x1e1   :  { %v4305_v28 = vpack.c.bf16 %v574_v26, %v572_v22  ;;  %v575_v52 = vmax.f32 %v532_v27, 0.0  ;;  %v536_v29 = vadd.f32 %v535_v51, %v4296_v15 }
 0x1e2   :  { %v537_v30 = vpop.f32.mrf.mxu1 }
 0x1e3   :  { %v4308_v31 = vpack.c.bf16 %v575_v52, %v573_v25  ;;  %v538_v32 = vadd.f32 %v537_v30, %v4299_v16  ;;  %v576_v34 = vmax.f32 %v536_v29, 0.0 }
 0x1e4   :  { %v539_v33 = vpop.f32.mrf.mxu1 }
 0x1e5   :  { %v540_v35 = vadd.f32 %v539_v33, %v4296_v15  ;;  %v577_v37 = vmax.f32 %v538_v32, 0.0 }
 0x1e6   :  { %v541_v36 = vpop.f32.mrf.mxu1 }
 0x1e7   :  { %v578_v38 = vmax.f32 %v540_v35, 0.0  ;;  %v542_v39 = vadd.f32 %v541_v36, %v4299_v16  ;;  %v3458_v35 = vld [vmem:[#allocation4 + $0xe8] ss:$16 sps:$4 sm:$0xff]  }
 0x1e8   :  { %v545_v40 = vpop.f32.mrf.mxu1 }
 0x1e9   :  { %v4313_v41 = vpack.c.bf16 %v578_v38, %v576_v34  ;;  %v579_v42 = vmax.f32 %v542_v39, 0.0  ;;  %v546_v43 = vadd.f32 %v545_v40, %v4296_v15  ;;  %v3455_v34 = vld [vmem:[#allocation4 + $0xe0] ss:$16 sps:$4 sm:$0xff]   ;;  %v3463_v38 = vld [vmem:[#allocation4 + $0xc4] ss:$16 sps:$4 sm:$0xff]  }
 0x1ea   :  { %v547_v44 = vpop.f32.mrf.mxu1  ;;  %v3466_v39 = vld [vmem:[#allocation4 + $0xcc] ss:$16 sps:$4 sm:$0xff]  }
 0x1eb   :  { %v4316_v45 = vpack.c.bf16 %v579_v42, %v577_v37  ;;  %v548_v46 = vadd.f32 %v547_v44, %v4299_v16  ;;  %v580_v48 = vmax.f32 %v546_v43, 0.0 }
 0x1ec   :  { %v549_v47 = vpop.f32.mrf.mxu1 }
 0x1ed   :  { %v550_v53 = vadd.f32 %v549_v47, %v4296_v15  ;;  %v581_v54 = vmax.f32 %v548_v46, 0.0 }
 0x1ee   :  { %v551_v50 = vpop.f32.mrf.mxu1 }
 0x1ef   :  { %v582_v55 = vmax.f32 %v550_v53, 0.0  ;;  %v552_v56 = vadd.f32 %v551_v50, %v4299_v16  ;;  %v3464_v53 = vld [vmem:[#allocation4 + $0xc8] ss:$16 sps:$4 sm:$0xff]  }
 0x1f0   :  { %v555_v57 = vpop.f32.mrf.mxu1 }
 0x1f1   :  { %v4321_v58 = vpack.c.bf16 %v582_v55, %v580_v48  ;;  %v583_v59 = vmax.f32 %v552_v56, 0.0  ;;  %v556_v60 = vadd.f32 %v555_v57, %v4296_v15  ;;  %v3461_v48 = vld [vmem:[#allocation4 + $0xc0] ss:$16 sps:$4 sm:$0xff]   ;;  %v3472_v55 = vld [vmem:[#allocation4 + $0xac] ss:$16 sps:$4 sm:$0xff]  }
 0x1f2   :  { %v557_v61 = vpop.f32.mrf.mxu1 }
 0x1f3   :  { %v4324_v62 = vpack.c.bf16 %v583_v59, %v581_v54  ;;  %v558_v63 = vadd.f32 %v557_v61, %v4299_v16  ;;  %v584_v2 = vmax.f32 %v556_v60, 0.0  ;;  %v3469_v54 = vld [vmem:[#allocation4 + $0xa4] ss:$16 sps:$4 sm:$0xff]  }
 0x1f4   :  { %v559_v1 = vpop.f32.mrf.mxu1 }
 0x1f5   :  { %v560_v3 = vadd.f32 %v559_v1, %v4296_v15  ;;  %v585_v5 = vmax.f32 %v558_v63, 0.0  ;;  %v3467_v1 = vld [vmem:[#allocation4 + $0xa0] ss:$16 sps:$4 sm:$0xff]  }
 0x1f6   :  { %v561_v4 = vpop.f32.mrf.mxu1 }
 0x1f7   :  { %v586_v6 = vmax.f32 %v560_v3, 0.0  ;;  %v562_v7 = vadd.f32 %v561_v4, %v4299_v16  ;;  %v3475_v4 = vld [vmem:[#allocation4 + $0x84] ss:$16 sps:$4 sm:$0xff]  }
 0x1f8   :  { %v4329_v8 = vpop.f32.mrf.mxu1 }
 0x1f9   :  { %v4331_v9 = vpack.c.bf16 %v586_v6, %v584_v2  ;;  %v587_v10 = vmax.f32 %v562_v7, 0.0  ;;  %v3470_v2 = vld [vmem:[#allocation4 + $0xa8] ss:$16 sps:$4 sm:$0xff]  }
 0x1fa   :  { %v4333_v11 = vpop.f32.mrf.mxu1 }
 0x1fb   :  { %v4335_v12 = vpack.c.bf16 %v587_v10, %v585_v5  ;;  %v3478_v5 = vld [vmem:[#allocation4 + $0x8c] ss:$16 sps:$4 sm:$0xff]  }
 0x1fc   :  { %v569_v13 = vpop.f32.mrf.mxu1 }
 0x1fe   :  { %v570_v14 = vpop.f32.mrf.mxu1 }
 0x241   :  { %v768_v17 = vpop.f32.mrf.mxu0 }
 0x242   :  { %v769_v22 = vadd.f32 %v768_v17, %v4296_v15 }
 0x243   :  { %v770_v18 = vpop.f32.mrf.mxu0 }
 0x244   :  { %v771_v20 = vadd.f32 %v770_v18, %v4299_v16  ;;  %v815_v52 = vmax.f32 %v769_v22, 0.0  ;;  %v3473_v18 = vld [vmem:[#allocation4 + $0x80] ss:$16 sps:$4 sm:$0xff]   ;;  %v3484_v22 = vld [vmem:[#allocation4 + $0x6c] ss:$16 sps:$4 sm:$0xff]  }
 0x245   :  { %v772_v19 = vpop.f32.mrf.mxu0 }
 0x246   :  { %v773_v21 = vadd.f32 %v772_v19, %v4296_v15  ;;  %v816_v27 = vmax.f32 %v771_v20, 0.0  ;;  %v3476_v19 = vld [vmem:[#allocation4 + $0x88] ss:$16 sps:$4 sm:$0xff]  }
 0x247   :  { %v774_v23 = vpop.f32.mrf.mxu0 }
 0x248   :  { %v775_v24 = vadd.f32 %v774_v23, %v4299_v16  ;;  %v817_v25 = vmax.f32 %v773_v21, 0.0  ;;  %v3481_v21 = vld [vmem:[#allocation4 + $0x64] ss:$16 sps:$4 sm:$0xff]  }
 0x249   :  { %v778_v26 = vpop.f32.mrf.mxu0 }
 0x24a   :  { %v818_v51 = vmax.f32 %v775_v24, 0.0  ;;  %v779_v29 = vadd.f32 %v778_v26, %v4296_v15  ;;  %v833_v36 = vpack.c.bf16 %v817_v25, %v815_v52  ;;  %v3479_v52 = vld [vmem:[#allocation4 + $0x60] ss:$16 sps:$4 sm:$0xff]  }
 0x24b   :  { %v780_v30 = vpop.f32.mrf.mxu0 }
 0x24c   :  { %v834_v32 = vpack.c.bf16 %v818_v51, %v816_v27  ;;  %v781_v33 = vadd.f32 %v780_v30, %v4299_v16  ;;  %v819_v42 = vmax.f32 %v779_v29, 0.0  ;;  %v3482_v29 = vld [vmem:[#allocation4 + $0x68] ss:$16 sps:$4 sm:$0xff]  }
 0x24d   :  { %v782_v37 = vpop.f32.mrf.mxu0 }
 0x24e   :  { %v783_v40 = vadd.f32 %v782_v37, %v4296_v15  ;;  %1323 = vmatprep.mubr.bf16.mxu1 %v834_v32  ;;  %1404 = vmatprep.mubr.bf16.mxu0 %v834_v32  ;;  %v820_v44 = vmax.f32 %v781_v33, 0.0  ;;  %v3487_v32 = vld [vmem:[#allocation4 + $0x44] ss:$16 sps:$4 sm:$0xff]   ;;  %v3490_v33 = vld [vmem:[#allocation4 + $0x4c] ss:$16 sps:$4 sm:$0xff]  }
 0x24f   :  { %v784_v43 = vpop.f32.mrf.mxu0  ;;  %1324 = vmatmul.mubr.bf16.vlgmr.msra.gmra.mxu1 %v833_v36  ;;  %1405 = vmatmul.mubr.bf16.vlgmr.msra.gmra.mxu0 %v833_v36 }
 0x250   :  { %v821_v46 = vmax.f32 %v783_v40, 0.0  ;;  %v785_v47 = vadd.f32 %v784_v43, %v4299_v16  ;;  %1774 = vmatpush1.bf16.msra.mxu1 %v3455_v34  ;;  %1855 = vmatpush1.bf16.msra.mxu0 %v3458_v35  ;;  %v3485_v40 = vld [vmem:[#allocation4 + $0x40] ss:$16 sps:$4 sm:$0xff]  }
 0x251   :  { %v788_v50 = vpop.f32.mrf.mxu0  ;;  %1775 = vmatprep.subr.bf16.mxu1 %v3463_v38  ;;  %1856 = vmatprep.subr.bf16.mxu0 %v3466_v39 }
 0x252   :  { %v822_v56 = vmax.f32 %v785_v47, 0.0  ;;  %v835_v57 = vpack.c.bf16 %v821_v46, %v819_v42  ;;  %v789_v59 = vadd.f32 %v788_v50, %v4296_v15  ;;  %v3488_v42 = vld [vmem:[#allocation4 + $0x48] ss:$16 sps:$4 sm:$0xff]   ;;  %v3496_v46 = vld [vmem:[#allocation4 + $0x2c] ss:$16 sps:$4 sm:$0xff]  }
 0x253   :  { %v790_v60 = vpop.f32.mrf.mxu0 }
 0x254   :  { %v836_v61 = vpack.c.bf16 %v822_v56, %v820_v44  ;;  %v791_v63 = vadd.f32 %v790_v60, %v4299_v16  ;;  %1776 = vmatpush1.bf16.msra.mxu1 %v3461_v48  ;;  %1857 = vmatpush1.bf16.msra.mxu0 %v3464_v53  ;;  %v823_v7 = vmax.f32 %v789_v59, 0.0  ;;  %v3493_v44 = vld [vmem:[#allocation4 + $0x24] ss:$16 sps:$4 sm:$0xff]   ;;  %v3494_v56 = vld [vmem:[#allocation4 + $0x28] ss:$16 sps:$4 sm:$0xff]  }
 0x255   :  { %v792_v3 = vpop.f32.mrf.mxu0  ;;  %1777 = vmatprep.subr.bf16.mxu1 %v3469_v54  ;;  %1858 = vmatprep.subr.bf16.mxu0 %v3472_v55  ;;  %v3491_v55 = vld [vmem:[#allocation4 + $0x20] ss:$16 sps:$4 sm:$0xff]   ;;  %v3499_v59 = vld [vmem:[#allocation4 + $0x4] ss:$16 sps:$4 sm:$0xff]   ;;  %v3502_v60 = vld [vmem:[#allocation4 + $0xc] ss:$16 sps:$4 sm:$0xff]  }
 0x256   :  { %v793_v6 = vadd.f32 %v792_v3, %v4296_v15  ;;  %1333 = vmatprep.mubr.bf16.mxu1 %v836_v61  ;;  %1414 = vmatprep.mubr.bf16.mxu0 %v836_v61  ;;  %v824_v13 = vmax.f32 %v791_v63, 0.0 }
 0x257   :  { %v794_v10 = vpop.f32.mrf.mxu0  ;;  %1334 = vmatmul.mubr.bf16.gmra.mxu1 %v835_v57  ;;  %1415 = vmatmul.mubr.bf16.gmra.mxu0 %v835_v57 }
 0x258   :  { %v825_v14 = vmax.f32 %v793_v6, 0.0  ;;  %v795_v17 = vadd.f32 %v794_v10, %v4299_v16  ;;  %1778 = vmatpush1.bf16.msra.mxu1 %v3467_v1  ;;  %1859 = vmatpush1.bf16.msra.mxu0 %v3470_v2  ;;  %v3505_v6 = vld [vmem:[#allocation4 + $0x1e4] ss:$16 sps:$4 sm:$0xff]  }
 0x259   :  { %v798_v20 = vpop.f32.mrf.mxu0  ;;  %1779 = vmatprep.subr.bf16.mxu1 %v3475_v4  ;;  %1860 = vmatprep.subr.bf16.mxu0 %v3478_v5  ;;  %v3497_v4 = vld [vmem:[#allocation4] ss:$16 sps:$4 sm:$0xff]   ;;  %v3500_v5 = vld [vmem:[#allocation4 + $0x8] ss:$16 sps:$4 sm:$0xff]  }
 0x25a   :  { %v826_v23 = vmax.f32 %v795_v17, 0.0  ;;  %v837_v24 = vpack.c.bf16 %v825_v14, %v823_v7  ;;  %v799_v25 = vadd.f32 %v798_v20, %v4296_v15  ;;  %v3508_v7 = vld [vmem:[#allocation4 + $0x1ec] ss:$16 sps:$4 sm:$0xff]   ;;  %v3506_v14 = vld [vmem:[#allocation4 + $0x1e8] ss:$16 sps:$4 sm:$0xff]  }
 0x25b   :  { %v800_v26 = vpop.f32.mrf.mxu0  ;;  %v3511_v17 = vld [vmem:[#allocation4 + $0x1c4] ss:$16 sps:$4 sm:$0xff]   ;;  %v3512_v20 = vld [vmem:[#allocation4 + $0x1c8] ss:$16 sps:$4 sm:$0xff]  }
 0x25c   :  { %v838_v27 = vpack.c.bf16 %v826_v23, %v824_v13  ;;  %v801_v51 = vadd.f32 %v800_v26, %v4299_v16  ;;  %1780 = vmatpush1.bf16.msra.mxu1 %v3473_v18  ;;  %1861 = vmatpush1.bf16.msra.mxu0 %v3476_v19  ;;  %v827_v35 = vmax.f32 %v799_v25, 0.0  ;;  %v3503_v13 = vld [vmem:[#allocation4 + $0x1e0] ss:$16 sps:$4 sm:$0xff]   ;;  %v3514_v18 = vld [vmem:[#allocation4 + $0x1cc] ss:$16 sps:$4 sm:$0xff]  }
 0x25d   :  { %v802_v30 = vpop.f32.mrf.mxu0  ;;  %1781 = vmatprep.subr.bf16.mxu1 %v3481_v21  ;;  %1862 = vmatprep.subr.bf16.mxu0 %v3484_v22  ;;  %v3509_v19 = vld [vmem:[#allocation4 + $0x1c0] ss:$16 sps:$4 sm:$0xff]   ;;  %v3517_v21 = vld [vmem:[#allocation4 + $0x1a4] ss:$16 sps:$4 sm:$0xff]   ;;  %v3520_v22 = vld [vmem:[#allocation4 + $0x1ac] ss:$16 sps:$4 sm:$0xff]  }
 0x25e   :  { %v803_v34 = vadd.f32 %v802_v30, %v4296_v15  ;;  %1343 = vmatprep.mubr.bf16.mxu1 %v838_v27  ;;  %1424 = vmatprep.mubr.bf16.mxu0 %v838_v27  ;;  %v828_v37 = vmax.f32 %v801_v51, 0.0  ;;  %v3515_v23 = vld [vmem:[#allocation4 + $0x1a0] ss:$16 sps:$4 sm:$0xff]   ;;  %v3523_v25 = vld [vmem:[#allocation4 + $0x184] ss:$16 sps:$4 sm:$0xff]  }
 0x25f   :  { %v804_v36 = vpop.f32.mrf.mxu0  ;;  %1344 = vmatmul.mubr.bf16.gmra.mxu1 %v837_v24  ;;  %1425 = vmatmul.mubr.bf16.gmra.mxu0 %v837_v24  ;;  %v3518_v24 = vld [vmem:[#allocation4 + $0x1a8] ss:$16 sps:$4 sm:$0xff]   ;;  %v3526_v26 = vld [vmem:[#allocation4 + $0x18c] ss:$16 sps:$4 sm:$0xff]   ;;  %v3521_v27 = vld [vmem:[#allocation4 + $0x180] ss:$16 sps:$4 sm:$0xff]  }
 0x260   :  { %v829_v38 = vmax.f32 %v803_v34, 0.0  ;;  %v805_v39 = vadd.f32 %v804_v36, %v4299_v16  ;;  %1782 = vmatpush1.bf16.msra.mxu1 %v3479_v52  ;;  %1863 = vmatpush1.bf16.msra.mxu0 %v3482_v29  ;;  %v3524_v51 = vld [vmem:[#allocation4 + $0x188] ss:$16 sps:$4 sm:$0xff]   ;;  %v3529_v52 = vld [vmem:[#allocation4 + $0x164] ss:$16 sps:$4 sm:$0xff]  }
 0x261   :  { %1783 = vmatprep.subr.bf16.mxu1 %v3487_v32  ;;  %1864 = vmatprep.subr.bf16.mxu0 %v3490_v33  ;;  %v808_v43 = vpop.f32.mrf.mxu0  ;;  %v3527_v29 = vld [vmem:[#allocation4 + $0x160] ss:$16 sps:$4 sm:$0xff]   ;;  %v3530_v30 = vld [vmem:[#allocation4 + $0x168] ss:$16 sps:$4 sm:$0xff]   ;;  %v3535_v32 = vld [vmem:[#allocation4 + $0x144] ss:$16 sps:$4 sm:$0xff]  }
 0x262   :  { %v830_v47 = vmax.f32 %v805_v39, 0.0  ;;  %v839_v48 = vpack.c.bf16 %v829_v38, %v827_v35  ;;  %v809_v53 = vadd.f32 %v808_v43, %v4296_v15  ;;  %v3538_v33 = vld [vmem:[#allocation4 + $0x14c] ss:$16 sps:$4 sm:$0xff]   ;;  %v3533_v34 = vld [vmem:[#allocation4 + $0x140] ss:$16 sps:$4 sm:$0xff]  }
 0x263   :  { %v810_v50 = vpop.f32.mrf.mxu0  ;;  %v3536_v35 = vld [vmem:[#allocation4 + $0x148] ss:$16 sps:$4 sm:$0xff]   ;;  %v3541_v36 = vld [vmem:[#allocation4 + $0x124] ss:$16 sps:$4 sm:$0xff]   ;;  %v3539_v38 = vld [vmem:[#allocation4 + $0x120] ss:$16 sps:$4 sm:$0xff]  }
 0x264   :  { %v840_v54 = vpack.c.bf16 %v830_v47, %v828_v37  ;;  %1784 = vmatpush1.bf16.msra.mxu1 %v3485_v40  ;;  %1865 = vmatpush1.bf16.msra.mxu0 %v3488_v42  ;;  %v811_v57 = vadd.f32 %v810_v50, %v4299_v16  ;;  %v831_v1 = vmax.f32 %v809_v53, 0.0  ;;  %v3544_v37 = vld [vmem:[#allocation4 + $0x12c] ss:$16 sps:$4 sm:$0xff]   ;;  %v3542_v39 = vld [vmem:[#allocation4 + $0x128] ss:$16 sps:$4 sm:$0xff]  }
 0x265   :  { %1785 = vmatprep.subr.bf16.mxu1 %v3493_v44  ;;  %1866 = vmatprep.subr.bf16.mxu0 %v3496_v46  ;;  %v812_v61 = vpop.f32.mrf.mxu0  ;;  %v3547_v40 = vld [vmem:[#allocation4 + $0x104] ss:$16 sps:$4 sm:$0xff]   ;;  %v3550_v42 = vld [vmem:[#allocation4 + $0x10c] ss:$16 sps:$4 sm:$0xff]   ;;  %v3545_v43 = vld [vmem:[#allocation4 + $0x100] ss:$16 sps:$4 sm:$0xff]   ;;  %v568_v46 = vadd.f32 %v4333_v11, %v4299_v16 }
 0x266   :  { %1353 = vmatprep.mubr.bf16.mxu1 %v840_v54  ;;  %1434 = vmatprep.mubr.bf16.mxu0 %v840_v54  ;;  %v832_v63 = vmax.f32 %v811_v57, 0.0  ;;  %v841_v10 = vpack.c.bf16 %v831_v1, %v831_v1  ;;  %v3548_v44 = vld [vmem:[#allocation4 + $0x108] ss:$16 sps:$4 sm:$0xff]   ;;  %v3551_v11 = vld [vmem:[#allocation6 + $0xe0] ss:$16 sps:$4 sm:$0xff]  }
 0x267   :  { %1354 = vmatmul.mubr.bf16.gmra.mxu1 %v839_v48  ;;  %1435 = vmatmul.mubr.bf16.gmra.mxu0 %v839_v48  ;;  %v813_v2 = vpop.f32.mrf.mxu0  ;;  %v3554_v47 = vld [vmem:[#allocation6 + $0xc0] ss:$16 sps:$4 sm:$0xff]   ;;  %v3565_v53 = vld [vmem:[#allocation6 + $0x64] ss:$16 sps:$4 sm:$0xff]  }
 0x268   :  { %v842_v3 = vpack.c.bf16 %v832_v63, %v832_v63  ;;  %1786 = vmatpush1.bf16.msra.mxu1 %v3491_v55  ;;  %1867 = vmatpush1.bf16.msra.mxu0 %v3494_v56  ;;  %v3560_v48 = vld [vmem:[#allocation6 + $0x80] ss:$16 sps:$4 sm:$0xff]   ;;  %v3568_v54 = vld [vmem:[#allocation6 + $0x44] ss:$16 sps:$4 sm:$0xff]  }
 0x269   :  { %1787 = vmatprep.subr.bf16.mxu1 %v3499_v59  ;;  %1868 = vmatprep.subr.bf16.mxu0 %v3502_v60  ;;  %v3563_v50 = vld [vmem:[#allocation6 + $0x60] ss:$16 sps:$4 sm:$0xff]   ;;  %v3571_v56 = vld [vmem:[#allocation6 + $0x24] ss:$16 sps:$4 sm:$0xff]  }
 0x26a   :  { %1363 = vmatprep.mubr.bf16.mxu1 %v842_v3  ;;  %1444 = vmatprep.mubr.bf16.mxu0 %v842_v3  ;;  %v3566_v55 = vld [vmem:[#allocation6 + $0x40] ss:$16 sps:$4 sm:$0xff]   ;;  %v3574_v1 = vld [vmem:[#allocation6 + $0x4] ss:$16 sps:$4 sm:$0xff]  }
 0x26b   :  { %v3569_v60 = vld [vmem:[#allocation6 + $0x20] ss:$16 sps:$4 sm:$0xff]  }
 0x26c   :  { %1788 = vmatpush1.bf16.msra.mxu1 %v3497_v4  ;;  %1869 = vmatpush1.bf16.msra.mxu0 %v3500_v5  ;;  %v3572_v4 = vld [vmem:[#allocation6] ss:$16 sps:$4 sm:$0xff]  }
 0x26d   :  { %1789 = vmatprep.subr.bf16.mxu1 %v3505_v6  ;;  %1870 = vmatprep.subr.bf16.mxu0 %v3508_v7 }
 0x26f   :  { %1364 = vmatmul.mubr.bf16.gmra.mxu1 %v841_v10  ;;  %1445 = vmatmul.mubr.bf16.gmra.mxu0 %v841_v10 }
 0x270   :  { %1790 = vmatpush2.bf16.msra.mxu1 %v3503_v13  ;;  %1871 = vmatpush2.bf16.msra.mxu0 %v3506_v14 }
 0x271   :  { %1805 = vmatprep.mubr.bf16.mxu1 %v4308_v31  ;;  %1886 = vmatprep.mubr.bf16.mxu0 %v4308_v31  ;;  %v3532_v31 = vld [vmem:[#allocation4 + $0x16c] ss:$16 sps:$4 sm:$0xff]  }
 0x272   :  { %1791 = vmatprep.subr.bf16.mxu1 %v3511_v17  ;;  %1872 = vmatprep.subr.bf16.mxu0 %v3514_v18 }
 0x274   :  { %1792 = vmatpush2.bf16.msra.mxu1 %v3509_v19  ;;  %1873 = vmatpush2.bf16.msra.mxu0 %v3512_v20 }
 0x275   :  { %1793 = vmatprep.subr.bf16.mxu1 %v3517_v21  ;;  %1874 = vmatprep.subr.bf16.mxu0 %v3520_v22  ;;  %v3577_v21 = vld [vmem:[#allocation6 + $0xec] ss:$16 sps:$4 sm:$0xff]  }
 0x278   :  { %1794 = vmatpush2.bf16.msra.mxu1 %v3515_v23  ;;  %1875 = vmatpush2.bf16.msra.mxu0 %v3518_v24 }
 0x279   :  { %1795 = vmatprep.subr.bf16.mxu1 %v3523_v25  ;;  %1876 = vmatprep.subr.bf16.mxu0 %v3526_v26 }
 0x27c   :  { %1796 = vmatpush2.bf16.msra.mxu1 %v3521_v27  ;;  %1877 = vmatpush2.bf16.msra.mxu0 %v3524_v51 }
 0x27d   :  { %1797 = vmatprep.subr.bf16.mxu1 %v3529_v52  ;;  %1878 = vmatprep.subr.bf16.mxu0 %v3532_v31 }
 0x280   :  { %1798 = vmatpush2.bf16.msra.mxu1 %v3527_v29  ;;  %1879 = vmatpush2.bf16.msra.mxu0 %v3530_v30 }
 0x281   :  { %1799 = vmatprep.subr.bf16.mxu1 %v3535_v32  ;;  %1880 = vmatprep.subr.bf16.mxu0 %v3538_v33 }
 0x284   :  { %1800 = vmatpush2.bf16.msra.mxu1 %v3533_v34  ;;  %1881 = vmatpush2.bf16.msra.mxu0 %v3536_v35 }
 0x285   :  { %1801 = vmatprep.subr.bf16.mxu1 %v3541_v36  ;;  %1882 = vmatprep.subr.bf16.mxu0 %v3544_v37 }
 0x288   :  { %1802 = vmatpush2.bf16.msra.mxu1 %v3539_v38  ;;  %1883 = vmatpush2.bf16.msra.mxu0 %v3542_v39 }
 0x289   :  { %1803 = vmatprep.subr.bf16.mxu1 %v3547_v40  ;;  %1884 = vmatprep.subr.bf16.mxu0 %v3550_v42 }
 0x28c   :  { %1804 = vmatpush2.bf16.msra.mxu1 %v3545_v43  ;;  %1885 = vmatpush2.bf16.msra.mxu0 %v3548_v44 }
 0x28f   :  { %1806 = vmatmul.mubr.bf16.vlgmr.msra.gmra.mxu1 %v4305_v28  ;;  %1887 = vmatmul.mubr.bf16.vlgmr.msra.gmra.mxu0 %v4305_v28  ;;  %v589_v28 = vmax.f32 %v568_v46, 0.0 }
 0x290   :  { %1815 = vmatprep.mubr.bf16.mxu1 %v4316_v45  ;;  %1896 = vmatprep.mubr.bf16.mxu0 %v4316_v45  ;;  %v566_v45 = vadd.f32 %v4329_v8, %v4296_v15  ;;  %v3559_v15 = vld [vmem:[#allocation6 + $0xa4] ss:$16 sps:$4 sm:$0xff]   ;;  %v3557_v8 = vld [vmem:[#allocation6 + $0xa0] ss:$16 sps:$4 sm:$0xff]  }
 0x292   :  { %v588_v16 = vmax.f32 %v566_v45, 0.0  ;;  %v95_v45 = vld [vmem:[#allocation9 + $0x10] sm:$0xff] }
 0x297   :  { %1816 = vmatmul.mubr.bf16.gmra.mxu1 %v4313_v41  ;;  %1897 = vmatmul.mubr.bf16.gmra.mxu0 %v4313_v41  ;;  %v599_v41 = vpack.c.bf16 %v589_v28, %v589_v28  ;;  %v1937_v28 = vsub.s32 2, %v4245_v49 }
 0x298   :  { %1825 = vmatprep.mubr.bf16.mxu1 %v4324_v62  ;;  %1906 = vmatprep.mubr.bf16.mxu0 %v4324_v62  ;;  %v598_v62 = vpack.c.bf16 %v588_v16, %v588_v16 }
 0x29f   :  { %1826 = vmatmul.mubr.bf16.gmra.mxu1 %v4321_v58  ;;  %1907 = vmatmul.mubr.bf16.gmra.mxu0 %v4321_v58  ;;  %v3553_v58 = vld [vmem:[#allocation6 + $0xe4] ss:$16 sps:$4 sm:$0xff]  }
 0x2a0   :  { %1835 = vmatprep.mubr.bf16.mxu1 %v4335_v12  ;;  %1916 = vmatprep.mubr.bf16.mxu0 %v4335_v12  ;;  %v3556_v12 = vld [vmem:[#allocation6 + $0xc4] ss:$16 sps:$4 sm:$0xff]  }
 0x2a1   :  { %2328 = vmatprep.subr.bf16.mxu1 %v3553_v58 }
 0x2a2   :  { %2329 = vmatpush1.bf16.msra.mxu1 %v3551_v11 }
 0x2a3   :  { %2330 = vmatprep.subr.bf16.mxu1 %v3556_v12 }
 0x2a6   :  { %2331 = vmatpush1.bf16.msra.mxu1 %v3554_v47 }
 0x2a7   :  { %1836 = vmatmul.mubr.bf16.gmra.mxu1 %v4331_v9  ;;  %1917 = vmatmul.mubr.bf16.gmra.mxu0 %v4331_v9  ;;  %v3562_v9 = vld [vmem:[#allocation6 + $0x84] ss:$16 sps:$4 sm:$0xff]  }
 0x2a8   :  { %1845 = vmatprep.mubr.bf16.mxu1 %v599_v41  ;;  %1926 = vmatprep.mubr.bf16.mxu0 %v599_v41  ;;  %v3867_v41 = vld [vmem:[#allocation9] sm:$0xff] }
 0x2a9   :  { %2332 = vmatprep.subr.bf16.mxu1 %v3559_v15  ;;  %v4439_v16 = vrot.slane %v3867_v41, %v1937_v28 }
 0x2aa   :  { %2333 = vmatpush1.bf16.msra.mxu1 %v3557_v8 }
 0x2ab   :  { %2334 = vmatprep.subr.bf16.mxu1 %v3562_v9 }
 0x2ae   :  { %2335 = vmatpush1.bf16.msra.mxu1 %v3560_v48 }
 0x2af   :  { %1846 = vmatmul.mubr.bf16.gmra.mxu1 %v598_v62  ;;  %1927 = vmatmul.mubr.bf16.gmra.mxu0 %v598_v62  ;;  %v4441_v62 = vrot.slane %v95_v45, %v1937_v28 }
 0x2b0   :  { %2360 = vmatprep.mubr.bf16.mxu1 %v4821_v0  ;;  %2336 = vmatprep.subr.bf16.mxu1 %v3565_v53 }
 0x2b2   :  { %2337 = vmatpush1.bf16.msra.mxu1 %v3563_v50  ;;  %v3868_v50 = vld [vmem:[#allocation9 + $0x8] sm:$0xff] }
 0x2b3   :  { %2338 = vmatprep.subr.bf16.mxu1 %v3568_v54  ;;  %v4449_v54 = vrot.slane %v3868_v50, %v1937_v28 }
 0x2b6   :  { %2339 = vmatpush1.bf16.msra.mxu1 %v3566_v55 }
 0x2b7   :  { %2340 = vmatprep.subr.bf16.mxu1 %v3571_v56 }
 0x2ba   :  { %2341 = vmatpush1.bf16.msra.mxu1 %v3569_v60 }
 0x2bb   :  { %2342 = vmatprep.subr.bf16.mxu1 %v3574_v1 }
 0x2be   :  { %2343 = vmatpush1.bf16.msra.mxu1 %v3572_v4 }
 0x2bf   :  { %2409 = vmatprep.subr.bf16.mxu1 %v3577_v21 }
 0x30f   :  { %v1325_v57 = vpop.f32.mrf.mxu1  ;;  %v1406_v59 = vpop.f32.mrf.mxu0 }
 0x311   :  { %v1327_v61 = vpop.f32.mrf.mxu1  ;;  %v4376_v63 = vpop.f32.mrf.mxu0 }
 0x313   :  { %v1329_v2 = vpop.f32.mrf.mxu1  ;;  %v1410_v3 = vpop.f32.mrf.mxu0 }
 0x315   :  { %v4378_v5 = vpop.f32.mrf.mxu1  ;;  %v4380_v6 = vpop.f32.mrf.mxu0 }
 0x317   :  { %v4382_v7 = vpop.f32.mrf.mxu1  ;;  %v4384_v10 = vpop.f32.mrf.mxu0 }
 0x319   :  { %v4386_v13 = vpop.f32.mrf.mxu1  ;;  %v4388_v14 = vpop.f32.mrf.mxu0 }
 0x31b   :  { %v4390_v17 = vpop.f32.mrf.mxu1  ;;  %v4392_v18 = vpop.f32.mrf.mxu0 }
 0x31d   :  { %v4394_v19 = vpop.f32.mrf.mxu1  ;;  %v4396_v20 = vpop.f32.mrf.mxu0 }
 0x31f   :  { %v4398_v22 = vpop.f32.mrf.mxu1  ;;  %v4400_v23 = vpop.f32.mrf.mxu0 }
 0x321   :  { %v4402_v24 = vpop.f32.mrf.mxu1  ;;  %v4404_v25 = vpop.f32.mrf.mxu0 }
 0x323   :  { %v4406_v26 = vpop.f32.mrf.mxu1  ;;  %v4408_v27 = vpop.f32.mrf.mxu0 }
 0x325   :  { %v4410_v51 = vpop.f32.mrf.mxu1  ;;  %v4412_v52 = vpop.f32.mrf.mxu0 }
 0x327   :  { %v4414_v31 = vpop.f32.mrf.mxu1  ;;  %v4416_v29 = vpop.f32.mrf.mxu0 }
 0x329   :  { %v4418_v30 = vpop.f32.mrf.mxu1  ;;  %v4420_v32 = vpop.f32.mrf.mxu0 }
 0x32b   :  { %v4422_v33 = vpop.f32.mrf.mxu1  ;;  %v4424_v34 = vpop.f32.mrf.mxu0 }
 0x32d   :  { %v4426_v35 = vpop.f32.mrf.mxu1  ;;  %v4428_v36 = vpop.f32.mrf.mxu0 }
 0x32f   :  { %v4430_v37 = vpop.f32.mrf.mxu1  ;;  %v4432_v38 = vpop.f32.mrf.mxu0 }
 0x331   :  { %v4434_v39 = vpop.f32.mrf.mxu1  ;;  %v4436_v40 = vpop.f32.mrf.mxu0 }
 0x333   :  { %v1369_v42 = vpop.f32.mrf.mxu1  ;;  %v1450_v43 = vpop.f32.mrf.mxu0 }
 0x335   :  { %v1370_v44 = vpop.f32.mrf.mxu1  ;;  %v1451_v46 = vpop.f32.mrf.mxu0 }
 0x336   :  { %v96_v46 = vld [vmem:[#allocation9 + $0x18] sm:$0xff] }
 0x34f   :  { %v1807_v58 = vpop.f32.mrf.mxu1  ;;  %v1888_v11 = vpop.f32.mrf.mxu0 }
 0x350   :  { %v1808_v12 = vadd.f32 %v1807_v58, %v1325_v57  ;;  %v1889_v47 = vadd.f32 %v1888_v11, %v1406_v59 }
 0x351   :  { %v1809_v15 = vpop.f32.mrf.mxu1  ;;  %v1890_v8 = vpop.f32.mrf.mxu0 }
 0x352   :  { %v4444_v9 = vadd.f32 %v4439_v16, %v1808_v12  ;;  %v4447_v48 = vadd.f32 %v4441_v62, %v1889_v47  ;;  %v1810_v53 = vadd.f32 %v1809_v15, %v1327_v61  ;;  %v1891_v15 = vadd.f32 %v1890_v8, %v4376_v63 }
 0x353   :  { %v1811_v55 = vpop.f32.mrf.mxu1  ;;  %v1892_v56 = vpop.f32.mrf.mxu0 }
 0x354   :  { %v3148_v60 = vmul.f32 -1.442695, %v4444_v9  ;;  %v1812_v1 = vadd.f32 %v1811_v55, %v1329_v2  ;;  %v1893_v4 = vadd.f32 %v1892_v56, %v1410_v3  ;;  %v4456_v42 = vadd.f32 %v4449_v54, %v1810_v53 }
 0x355   :  { %v1813_v57 = vpop.f32.mrf.mxu1  ;;  %v1894_v59 = vpop.f32.mrf.mxu0  ;;  %v4470_v53 = vrot.slane %v96_v46, %v1937_v28 }
 0x356   :  { %3615 = vpow2.f32 %v3148_v60  ;;  %v4453_v21 = vadd.f32 %v4439_v16, %v1812_v1  ;;  %v4459_v44 = vadd.f32 %v4441_v62, %v1893_v4  ;;  %v1814_v3 = vadd.f32 %v1813_v57, %v4378_v5 }
 0x357   :  { %v1817_v43 = vpop.f32.mrf.mxu1  ;;  %v1898_v61 = vpop.f32.mrf.mxu0  ;;  %v3149_v47 = vmul.f32 -1.442695, %v4456_v42  ;;  %v1895_v5 = vadd.f32 %v1894_v59, %v4380_v6  ;;  %v4487_v6 = vadd.f32 %v4470_v53, %v1891_v15 }
 0x358   :  { %v3150_v45 = vmul.f32 -1.442695, %v4453_v21  ;;  %v1818_v2 = vadd.f32 %v1817_v43, %v4382_v7  ;;  %v1899_v41 = vadd.f32 %v1898_v61, %v4384_v10  ;;  %v4480_v1 = vadd.f32 %v4449_v54, %v1814_v3 }
 0x359   :  { %v1819_v58 = vpop.f32.mrf.mxu1  ;;  %v1900_v11 = vpop.f32.mrf.mxu0  ;;  %v4494_v43 = vadd.f32 %v4470_v53, %v1895_v5 }
 0x35a   :  { %3617 = vpow2.f32 %v3150_v45  ;;  %v4466_v12 = vadd.f32 %v4439_v16, %v1818_v2  ;;  %v4473_v7 = vadd.f32 %v4441_v62, %v1899_v41  ;;  %v1820_v56 = vadd.f32 %v1819_v58, %v4386_v13 }
 0x35b   :  { %v1821_v50 = vpop.f32.mrf.mxu1  ;;  %v1902_v55 = vpop.f32.mrf.mxu0  ;;  %v3151_v45 = vmul.f32 -1.442695, %v4480_v1 }
 0x35c   :  { %v3152_v10 = vmul.f32 -1.442695, %v4466_v12  ;;  %v1822_v60 = vadd.f32 %v1821_v50, %v4390_v17  ;;  %v1903_v63 = vadd.f32 %v1902_v55, %v4392_v18  ;;  %v4497_v18 = vadd.f32 %v4449_v54, %v1820_v56 }
 0x35d   :  { %v1823_v28 = vpop.f32.mrf.mxu1  ;;  %v1904_v8 = vpop.f32.mrf.mxu0 }
 0x35e   :  { %3619 = vpow2.f32 %v3152_v10  ;;  %v4484_v4 = vadd.f32 %v4439_v16, %v1822_v60  ;;  %v1824_v57 = vadd.f32 %v1823_v28, %v4394_v19  ;;  %v4491_v17 = vadd.f32 %v4441_v62, %v1903_v63 }
 0x35f   :  { %3621 = vpow2.f32 %v3149_v47  ;;  %v1827_v13 = vpop.f32.mrf.mxu1  ;;  %v1908_v59 = vpop.f32.mrf.mxu0 }
 0x360   :  { %v3154_v61 = vmul.f32 -1.442695, %v4484_v4  ;;  %v1828_v46 = vadd.f32 %v1827_v13, %v4398_v22  ;;  %v1909_v2 = vadd.f32 %v1908_v59, %v4400_v23  ;;  %v4508_v47 = vadd.f32 %v4449_v54, %v1824_v57 }
 0x361   :  { %v1829_v19 = vpop.f32.mrf.mxu1  ;;  %v1910_v3 = vpop.f32.mrf.mxu0  ;;  %v3153_v23 = vmul.f32 -1.442695, %v4497_v18  ;;  %v1901_v57 = vadd.f32 %v1900_v11, %v4388_v14  ;;  %v1905_v13 = vadd.f32 %v1904_v8, %v4396_v20 }
 0x362   :  { %3623 = vpow2.f32 %v3154_v61  ;;  %v4504_v41 = vadd.f32 %v4439_v16, %v1828_v46  ;;  %v4511_v22 = vadd.f32 %v4441_v62, %v1909_v2  ;;  %v1830_v10 = vadd.f32 %v1829_v19, %v4402_v24 }
 0x363   :  { %v3616_v58 = vpop.eup %3615  ;;  %3625 = vtanh.f32 %v4487_v6  ;;  %v1831_v15 = vpop.f32.mrf.mxu1  ;;  %v3155_v61 = vmul.f32 -1.442695, %v4508_v47 }
 0x364   :  { %v1912_v50 = vpop.f32.mrf.mxu0  ;;  %v2041_v55 = vadd.f32 1.0, %v3616_v58  ;;  %3627 = vtanh.f32 %v4494_v43  ;;  %v3156_v5 = vmul.f32 -1.442695, %v4504_v41  ;;  %v1832_v56 = vadd.f32 %v1831_v15, %v4406_v26 }
 0x365   :  { %3629 = vpow2.f32 %v3151_v45  ;;  %v1913_v60 = vadd.f32 %v1912_v50, %v4408_v27  ;;  %v1833_v63 = vpop.f32.mrf.mxu1  ;;  %v4532_v14 = vadd.f32 %v4449_v54, %v1830_v10  ;;  %v4540_v15 = vadd.f32 %v4470_v53, %v1901_v57 }
 0x366   :  { %v4519_v28 = vpop.f32.mrf.mxu0  ;;  %3631 = vrcp.f32 %v2041_v55  ;;  %v4525_v46 = vadd.f32 %v4439_v16, %v1832_v56  ;;  %v1834_v11 = vadd.f32 %v1833_v63, %v4410_v51 }
 0x367   :  { %v3618_v59 = vpop.eup %3617  ;;  %3633 = vpow2.f32 %v3156_v5  ;;  %v1837_v24 = vpop.f32.mrf.mxu1  ;;  %v4528_v26 = vadd.f32 %v4441_v62, %v1913_v60  ;;  %v3157_v56 = vmul.f32 -1.442695, %v4532_v14 }
 0x368   :  { %v1918_v45 = vpop.f32.mrf.mxu0  ;;  %v2043_v27 = vadd.f32 1.0, %v3618_v59  ;;  %3635 = vpow2.f32 %v3153_v23  ;;  %v1838_v2 = vadd.f32 %v1837_v24, %v4414_v31  ;;  %v3158_v20 = vmul.f32 -1.442695, %v4525_v46 }
 0x369   :  { %v1919_v8 = vadd.f32 %v1918_v45, %v4416_v29  ;;  %v1839_v19 = vpop.f32.mrf.mxu1  ;;  %v4543_v31 = vadd.f32 %v4470_v53, %v1905_v13  ;;  %v4553_v60 = vadd.f32 %v4449_v54, %v1834_v11  ;;  %v1911_v59 = vadd.f32 %v1910_v3, %v4404_v25 }
 0x36a   :  { %v4537_v58 = vpop.f32.mrf.mxu0  ;;  %3637 = vrcp.f32 %v2043_v27  ;;  %v4546_v55 = vadd.f32 %v4439_v16, %v1838_v2 }
 0x36b   :  { %v3620_v50 = vpop.eup %3619  ;;  %3639 = vpow2.f32 %v3155_v61  ;;  %v1841_v23 = vpop.f32.mrf.mxu1  ;;  %v4549_v51 = vadd.f32 %v4441_v62, %v1919_v8  ;;  %v3159_v25 = vmul.f32 -1.442695, %v4553_v60 }
 0x36c   :  { %v1922_v5 = vpop.f32.mrf.mxu0  ;;  %v3622_v29 = vpop.eup %3621  ;;  %v2045_v10 = vadd.f32 1.0, %v3620_v50  ;;  %3641 = vpow2.f32 %v3158_v20  ;;  %v3160_v24 = vmul.f32 -1.442695, %v4546_v55  ;;  %v1842_v45 = vadd.f32 %v1841_v23, %v4422_v33 }
 0x36d   :  { %v1923_v63 = vadd.f32 %v1922_v5, %v4424_v34  ;;  %v1843_v57 = vpop.f32.mrf.mxu1  ;;  %3643 = vtanh.f32 %v4540_v15  ;;  %v2042_v11 = vadd.f32 1.0, %v3622_v29  ;;  %v4571_v33 = vadd.f32 %v4470_v53, %v1911_v59 }
 0x36e   :  { %v4556_v13 = vpop.f32.mrf.mxu0  ;;  %3645 = vtanh.f32 %v4543_v31  ;;  %v4574_v29 = vadd.f32 %v4439_v16, %v1842_v45  ;;  %v1840_v45 = vadd.f32 %v1839_v19, %v4418_v30 }
 0x36f   :  { %v3624_v61 = vpop.eup %3623  ;;  %v1847_v27 = vpop.f32.mrf.mxu1  ;;  %v4564_v20 = vadd.f32 %v4441_v62, %v1923_v63  ;;  %3647 = vrcp.f32 %v2045_v10 }
 0x370   :  { %v1928_v2 = vpop.f32.mrf.mxu0  ;;  %v3626_v34 = vpop.eup %3625  ;;  %v2047_v8 = vadd.f32 1.0, %v3624_v61  ;;  %3649 = vpow2.f32 %v3157_v56  ;;  %v1848_v59 = vadd.f32 %v1847_v27, %v4430_v37  ;;  %v4598_v37 = vadd.f32 %v4449_v54, %v1840_v45 }
 0x371   :  { %4832 = vst [vmem:[#allocation14_spill] sm:$0xff] %v4564_v20  ;;  %v3628_v50 = vpop.eup %3627  ;;  %v1929_v3 = vadd.f32 %v1928_v2, %v4432_v38  ;;  %v1849_v5 = vpop.f32.mrf.mxu1  ;;  %v1915_v2 = vadd.f32 %v4519_v28, %v4412_v52  ;;  %v1925_v45 = vadd.f32 %v4556_v13, %v4428_v36 }
 0x372   :  { %v4568_v0 = vpop.f32.mrf.mxu0  ;;  %v3630_v49 = vpop.eup %3629  ;;  %3651 = vrcp.f32 %v2047_v8  ;;  %v4595_v30 = vadd.f32 %v4439_v16, %v1848_v59 }
 0x373   :  { %v3632_v23 = vpop.eup %3631  ;;  %3653 = vpow2.f32 %v3160_v24  ;;  %v1851_v10 = vpop.f32.mrf.mxu1  ;;  %v4577_v56 = vadd.f32 %v4441_v62, %v1929_v3  ;;  %v2044_v20 = vadd.f32 1.0, %v3630_v49  ;;  %v4592_v49 = vadd.f32 %v4470_v53, %v1915_v2 }
 0x374   :  { %v1932_v63 = vpop.f32.mrf.mxu0  ;;  %v3634_v61 = vpop.eup %3633  ;;  %3655 = vrcp.f32 %v2042_v11  ;;  %v4579_v38 = vmul.f32 %v3632_v23, %v3626_v34  ;;  %v3162_v34 = vmul.f32 -1.442695, %v4574_v29  ;;  %v1844_v11 = vadd.f32 %v1843_v57, %v4426_v35 }
 0x375   :  { %v3636_v8 = vpop.eup %3635  ;;  %v2049_v24 = vadd.f32 1.0, %v3634_v61  ;;  %3657 = vpow2.f32 %v3159_v25  ;;  %v1852_v10 = vpop.f32.mrf.mxu1  ;;  %v1921_v35 = vadd.f32 %v4537_v58, %v4420_v32  ;;  %v3161_v61 = vmul.f32 -1.442695, %v4598_v37 }
 0x376   :  { %v1933_v63 = vpop.f32.mrf.mxu0  ;;  %3659 = vtanh.f32 %v4571_v33  ;;  %v2046_v19 = vadd.f32 1.0, %v3636_v8  ;;  %v4604_v25 = vadd.f32 %v4449_v54, %v1844_v11  ;;  %v1850_v10 = vadd.f32 %v1849_v5, %v4434_v39 }
 0x377   :  { %v3638_v62 = vpop.eup %3637  ;;  %3661 = vrcp.f32 %v2049_v24  ;;  %v4610_v32 = vadd.f32 %v4470_v53, %v1921_v35  ;;  %v4622_v35 = vadd.f32 %v4470_v53, %v1925_v45  ;;  %v3580_v45 = vld [vmem:[#allocation6 + $0xcc] ss:$16 sps:$4 sm:$0xff]  }
 0x378   :  { %v3640_v3 = vpop.eup %3639  ;;  %3663 = vtanh.f32 %v4579_v38  ;;  %v4589_v52 = vmul.f32 %v3638_v62, %v3628_v50  ;;  %v3163_v59 = vmul.f32 -1.442695, %v4604_v25  ;;  %v4625_v36 = vadd.f32 %v4449_v54, %v1850_v10 }
 0x379   :  { %3665 = vrcp.f32 %v2044_v20  ;;  %v3642_v28 = vpop.eup %3641  ;;  %v2048_v27 = vadd.f32 1.0, %v3640_v3  ;;  %v3164_v20 = vmul.f32 -1.442695, %v4595_v30 }
 0x37a   :  { %3667 = vtanh.f32 %v4589_v52  ;;  %v3644_v57 = vpop.eup %3643  ;;  %v2051_v50 = vadd.f32 1.0, %v3642_v28  ;;  %v3165_v54 = vmul.f32 -1.442695, %v4625_v36 }
 0x37b   :  { %3669 = vpow2.f32 %v3162_v34  ;;  %v3646_v16 = vpop.eup %3645 }
 0x37c   :  { %3671 = vtanh.f32 %v4592_v49  ;;  %v3648_v23 = vpop.eup %3647 }
 0x37d   :  { %3673 = vrcp.f32 %v2051_v50  ;;  %v3650_v2 = vpop.eup %3649  ;;  %v4613_v24 = vmul.f32 %v3648_v23, %v3644_v57  ;;  %v1931_v50 = vadd.f32 %v4568_v0, %v4436_v40 }
 0x37e   :  { %3675 = vrcp.f32 %v2046_v19  ;;  %v2050_v28 = vadd.f32 1.0, %v3650_v2 }
 0x37f   :  { %v3652_v58 = vpop.eup %3651  ;;  %3677 = vrcp.f32 %v2048_v27  ;;  %v4641_v0 = vadd.f32 %v4470_v53, %v1931_v50 }
 0x380   :  { %v3654_v8 = vpop.eup %3653  ;;  %3679 = vpow2.f32 %v3164_v20  ;;  %v4618_v11 = vmul.f32 %v3652_v58, %v3646_v16  ;;  %v3575_v58 = vld [vmem:[#allocation6 + $0xe8] ss:$16 sps:$4 sm:$0xff]  }
 0x381   :  { %v3656_v63 = vpop.eup %3655  ;;  %v2053_v62 = vadd.f32 1.0, %v3654_v8  ;;  %3681 = vpow2.f32 %v3161_v61 }
 0x382   :  { %v3658_v34 = vpop.eup %3657  ;;  %4833 = vst [vmem:[#allocation15_spill] sm:$0xff] %v4618_v11  ;;  %3683 = vtanh.f32 %v4610_v32 }
 0x383   :  { %v3660_v3 = vpop.eup %3659  ;;  %3685 = vpow2.f32 %v3163_v59  ;;  %v2052_v13 = vadd.f32 1.0, %v3658_v34  ;;  %v3578_v34 = vld [vmem:[#allocation6 + $0xc8] ss:$16 sps:$4 sm:$0xff]  }
 0x384   :  { %v3662_v19 = vpop.eup %3661  ;;  %3687 = vtanh.f32 %v4613_v24 }
 0x385   :  { %v3664_v39 = vpop.eup %3663  ;;  %3689 = vrcp.f32 %v2053_v62  ;;  %v4628_v57 = vmul.f32 %v3662_v19, %v3660_v3  ;;  %v4836_v3 = vmov 0  }
 0x386   :  { %v3666_v5 = vpop.eup %3665  ;;  %3691 = vtanh.f32 %v4618_v11  ;;  %v2122_v20 = vmul.f32 %v3664_v39, %v3656_v63  ;;  %v3583_v39 = vld [vmem:[#allocation6 + $0xac] ss:$16 sps:$4 sm:$0xff]  }
 0x387   :  { %4834 = vst [vmem:[#allocation16_spill] sm:$0xff] %v4628_v57  ;;  %v3668_v27 = vpop.eup %3667  ;;  %3693 = vrcp.f32 %v2050_v28 }
 0x388   :  { %v3670_v16 = vpop.eup %3669  ;;  %3695 = vtanh.f32 %v4622_v35  ;;  %v2123_v23 = vmul.f32 %v3668_v27, %v3666_v5  ;;  %v3581_v27 = vld [vmem:[#allocation6 + $0xa8] ss:$16 sps:$4 sm:$0xff]  }
 0x389   :  { %v3672_v61 = vpop.eup %3671  ;;  %3697 = vrcp.f32 %v2052_v13  ;;  %v2055_v2 = vadd.f32 1.0, %v3670_v16  ;;  %v3586_v16 = vld [vmem:[#allocation6 + $0x8c] ss:$16 sps:$4 sm:$0xff]  }
 0x38a   :  { %v3674_v59 = vpop.eup %3673  ;;  %v4635_v8 = vpack.c.bf16 %v2123_v23, %v2122_v20  ;;  %3699 = vtanh.f32 %v4628_v57 }
 0x38b   :  { %v3676_v10 = vpop.eup %3675  ;;  %v4638_v62 = vmul.f32 %v3674_v59, %v3672_v61  ;;  %3701 = vrcp.f32 %v2055_v2 }
 0x38c   :  { %v3678_v40 = vpop.eup %3677  ;;  %3703 = vpow2.f32 %v3165_v54  ;;  %2361 = vmatmul.mubr.bf16.vlgmr.msra.gmra.mxu1 %v4635_v8 }
 0x38d   :  { %4835 = vst [vmem:[#allocation17_spill] sm:$0xff] %v4638_v62  ;;  %v3680_v63 = vpop.eup %3679  ;;  %2410 = vmatpush1.bf16.msra.mxu1 %v3575_v58  ;;  %2370 = vmatprep.mubr.bf16.mxu1 %v4836_v3  ;;  %3705 = vtanh.f32 %v4638_v62 }
 0x38e   :  { %v3682_v28 = vpop.eup %3681  ;;  %v2057_v19 = vadd.f32 1.0, %v3680_v63  ;;  %2411 = vmatprep.subr.bf16.mxu1 %v3580_v45  ;;  %3707 = vtanh.f32 %v4641_v0  ;;  %v3584_v45 = vld [vmem:[#allocation6 + $0x88] ss:$16 sps:$4 sm:$0xff]  }
 0x38f   :  { %v3684_v13 = vpop.eup %3683  ;;  %v2054_v23 = vadd.f32 1.0, %v3682_v28 }
 0x390   :  { %v3686_v53 = vpop.eup %3685  ;;  %3709 = vrcp.f32 %v2057_v19 }
 0x391   :  { %v3688_v5 = vpop.eup %3687  ;;  %2412 = vmatpush1.bf16.msra.mxu1 %v3578_v34  ;;  %v2056_v62 = vadd.f32 1.0, %v3686_v53  ;;  %v3589_v34 = vld [vmem:[#allocation6 + $0x6c] ss:$16 sps:$4 sm:$0xff]   ;;  %3711 = vrcp.f32 %v2054_v23 }
 0x392   :  { %v3690_v50 = vpop.eup %3689  ;;  %2413 = vmatprep.subr.bf16.mxu1 %v3583_v39  ;;  %v2124_v61 = vmul.f32 %v3688_v5, %v3676_v10  ;;  %v3587_v10 = vld [vmem:[#allocation6 + $0x68] ss:$16 sps:$4 sm:$0xff]  }
 0x393   :  { %v3692_v54 = vpop.eup %3691  ;;  %v4647_v59 = vmul.f32 %v3690_v50, %v3684_v13  ;;  %v3592_v13 = vld [vmem:[#allocation6 + $0x4c] ss:$16 sps:$4 sm:$0xff]  }
 0x394   :  { %v3694_v20 = vpop.eup %3693  ;;  %v2125_v2 = vmul.f32 %v3692_v54, %v3678_v40 }
 0x395   :  { %v3696_v58 = vpop.eup %3695  ;;  %2414 = vmatpush1.bf16.msra.mxu1 %v3581_v27  ;;  %3713 = vtanh.f32 %v4647_v59 }
 0x396   :  { %v3698_v63 = vpop.eup %3697  ;;  %v4649_v57 = vpack.c.bf16 %v2125_v2, %v2124_v61  ;;  %2415 = vmatprep.subr.bf16.mxu1 %v3586_v16  ;;  %3715 = vrcp.f32 %v2056_v62  ;;  %v3595_v61 = vld [vmem:[#allocation6 + $0x2c] ss:$16 sps:$4 sm:$0xff]   ;;  %v3593_v62 = vld [vmem:[#allocation6 + $0x28] ss:$16 sps:$4 sm:$0xff]  }
 0x397   :  { %v3700_v19 = vpop.eup %3699 }
 0x398   :  { %4837 = vst [vmem:[#allocation18_spill] sm:$0xff] %v4649_v57  ;;  %v3702_v11 = vpop.eup %3701  ;;  %2371 = vmatmul.mubr.bf16.gmra.mxu1 %v4649_v57  ;;  %v2126_v53 = vmul.f32 %v3700_v19, %v3694_v20  ;;  %v3598_v20 = vld [vmem:[#allocation6 + $0xc] ss:$16 sps:$4 sm:$0xff]  }
 0x399   :  { %v3704_v39 = vpop.eup %3703  ;;  %v4652_v28 = vmul.f32 %v3702_v11, %v3696_v58  ;;  %2380 = vmatprep.mubr.bf16.mxu1 %v4836_v3  ;;  %2416 = vmatpush1.bf16.msra.mxu1 %v3584_v45  ;;  %v3590_v11 = vld [vmem:[#allocation6 + $0x48] ss:$16 sps:$4 sm:$0xff]  }
 0x39a   :  { %v3706_v40 = vpop.eup %3705  ;;  %2417 = vmatprep.subr.bf16.mxu1 %v3589_v34  ;;  %v2058_v16 = vadd.f32 1.0, %v3704_v39  ;;  %v3596_v58 = vld [vmem:[#allocation6 + $0x8] ss:$16 sps:$4 sm:$0xff]  }
 0x39b   :  { %v2127_v5 = vmul.f32 %v3706_v40, %v3698_v63  ;;  %3717 = vtanh.f32 %v4652_v28  ;;  %v3708_v27 = vpop.eup %3707 }
 0x39d   :  { %v3710_v50 = vpop.eup %3709  ;;  %v4657_v54 = vpack.c.bf16 %v2127_v5, %v2126_v53  ;;  %2418 = vmatpush1.bf16.msra.mxu1 %v3587_v10 }
 0x39e   :  { %v4659_v23 = vmul.f32 %v3710_v50, %v3708_v27  ;;  %2419 = vmatprep.subr.bf16.mxu1 %v3592_v13  ;;  %v3712_v2 = vpop.eup %3711  ;;  %v3599_v27 = vld [vmem:[#allocation7 + $0x78] sm:$0xff]  }
 0x39f   :  { %4838 = vst [vmem:[#allocation19_spill] sm:$0xff] %v4657_v54  ;;  %v3600_v50 = vld [vmem:[#allocation7 + $0x38] sm:$0xff]   ;;  %3241 = vmatprep.subr.bf16.mxu0 %v3599_v27 }
 0x3a0   :  { %2381 = vmatmul.mubr.bf16.gmra.mxu1 %v4657_v54  ;;  %3719 = vtanh.f32 %v4659_v23  ;;  %3242 = vmatpush3.bf16.msra.mxu0 %v3600_v50 }
 0x3a1   :  { %3721 = vrcp.f32 %v2058_v16  ;;  %2390 = vmatprep.mubr.bf16.mxu1 %v4836_v3  ;;  %2420 = vmatpush1.bf16.msra.mxu1 %v3590_v11  ;;  %v3601_v16 = vld [vmem:[#allocation7 + $0x70] sm:$0xff]  }
 0x3a2   :  { %2421 = vmatprep.subr.bf16.mxu1 %v3595_v61  ;;  %v3714_v45 = vpop.eup %3713  ;;  %v3602_v11 = vld [vmem:[#allocation7 + $0x30] sm:$0xff]   ;;  %3243 = vmatprep.subr.bf16.mxu0 %v3601_v16  ;;  %v3603_v61 = vld [vmem:[#allocation7 + $0x68] sm:$0xff]  }
 0x3a3   :  { %v3716_v63 = vpop.eup %3715  ;;  %v2128_v19 = vmul.f32 %v3714_v45, %v3712_v2  ;;  %v3606_v2 = vld [vmem:[#allocation7 + $0x20] sm:$0xff]   ;;  %v3609_v45 = vld [vmem:[#allocation7 + $0x50] sm:$0xff]  }
 0x3a4   :  { %3244 = vmatpush3.bf16.msra.mxu0 %v3602_v11 }
 0x3a5   :  { %2422 = vmatpush1.bf16.msra.mxu1 %v3593_v62  ;;  %v3604_v62 = vld [vmem:[#allocation7 + $0x28] sm:$0xff]   ;;  %3245 = vmatprep.subr.bf16.mxu0 %v3603_v61 }
 0x3a6   :  { %2423 = vmatprep.subr.bf16.mxu1 %v3598_v20  ;;  %v3605_v20 = vld [vmem:[#allocation7 + $0x60] sm:$0xff]  }
 0x3a8   :  { %v3718_v34 = vpop.eup %3717  ;;  %3246 = vmatpush3.bf16.msra.mxu0 %v3604_v62 }
 0x3a9   :  { %v2129_v39 = vmul.f32 %v3718_v34, %v3716_v63  ;;  %2424 = vmatpush1.bf16.msra.mxu1 %v3596_v58  ;;  %3247 = vmatprep.subr.bf16.mxu0 %v3605_v20  ;;  %v3607_v58 = vld [vmem:[#allocation7 + $0x58] sm:$0xff]   ;;  %v3610_v63 = vld [vmem:[#allocation7 + $0x10] sm:$0xff]   ;;  %v3611_v34 = vld [vmem:[#allocation7 + $0x48] sm:$0xff]  }
 0x3ab   :  { %v4664_v10 = vpack.c.bf16 %v2129_v39, %v2128_v19  ;;  %v3612_v19 = vld [vmem:[#allocation7 + $0x8] sm:$0xff]   ;;  %v3613_v39 = vld [vmem:[#allocation7 + $0x40] sm:$0xff]  }
 0x3ac   :  { %3248 = vmatpush3.bf16.msra.mxu0 %v3606_v2 }
 0x3ad   :  { %4839 = vst [vmem:[#allocation20_spill] sm:$0xff] %v4664_v10  ;;  %v3720_v40 = vpop.eup %3719  ;;  %2391 = vmatmul.mubr.bf16.gmra.mxu1 %v4664_v10  ;;  %3249 = vmatprep.subr.bf16.mxu0 %v3607_v58 }
 0x3ae   :  { %v3722_v13 = vpop.eup %3721  ;;  %2400 = vmatprep.mubr.bf16.mxu1 %v4836_v3 }
 0x3af   :  { %v2130_v53 = vmul.f32 %v3722_v13, %v3720_v40  ;;  %v3614_v40 = vld [vmem:[#allocation7] sm:$0xff]  }
 0x3b1   :  { %v4668_v5 = vpack.c.bf16 %v2130_v53, %v2130_v53 }
 0x3b3   :  { %4840 = vst [vmem:[#allocation21_spill] sm:$0xff] %v4668_v5 }
 0x3b5   :  { %2401 = vmatmul.mubr.bf16.gmra.mxu1 %v4668_v5 }
 0x3b6   :  { %2441 = vmatprep.mubr.bf16.mxu1 %v4836_v3 }
 0x3bd   :  { %2442 = vmatmul.mubr.bf16.vlgmr.msra.gmra.mxu1 %v4635_v8 }
 0x3be   :  { %2451 = vmatprep.mubr.bf16.mxu1 %v4836_v3 }
 0x3c5   :  { %2452 = vmatmul.mubr.bf16.gmra.mxu1 %v4649_v57 }
 0x3c6   :  { %2461 = vmatprep.mubr.bf16.mxu1 %v4836_v3 }
 0x3cd   :  { %2462 = vmatmul.mubr.bf16.gmra.mxu1 %v4657_v54 }
 0x3ce   :  { %2471 = vmatprep.mubr.bf16.mxu1 %v4836_v3 }
 0x3d5   :  { %2472 = vmatmul.mubr.bf16.gmra.mxu1 %v4664_v10 }
 0x3d6   :  { %2481 = vmatprep.mubr.bf16.mxu1 %v4836_v3  ;;  %v3608_v3 = vld [vmem:[#allocation7 + $0x18] sm:$0xff]  }
 0x3d7   :  { %3250 = vmatpush3.bf16.msra.mxu0 %v3608_v3 }
 0x3d8   :  { %3251 = vmatprep.subr.bf16.mxu0 %v3609_v45 }
 0x3db   :  { %3252 = vmatpush3.bf16.msra.mxu0 %v3610_v63 }
 0x3dc   :  { %3253 = vmatprep.subr.bf16.mxu0 %v3611_v34 }
 0x3dd   :  { %2482 = vmatmul.mubr.bf16.gmra.mxu1 %v4668_v5 }
 0x3df   :  { %3254 = vmatpush3.bf16.msra.mxu0 %v3612_v19 }
 0x3e0   :  { %3255 = vmatprep.subr.bf16.mxu0 %v3613_v39 }
 0x3e3   :  { %3256 = vmatpush3.bf16.msra.mxu0 %v3614_v40 }
 0x44c   :  { %v2362_v13 = vpop.f32.mrf.mxu1 }
 0x44d   :  { %v2490_v2 = vadd.f32 %v2362_v13, %v4444_v9 }
 0x44e   :  { %v2364_v53 = vpop.f32.mrf.mxu1 }
 0x44f   :  { %v2491_v3 = vadd.f32 %v2364_v53, %v4456_v42  ;;  %v3198_v19 = vmul.f32 -1.442695, %v2490_v2 }
 0x450   :  { %v2366_v27 = vpop.f32.mrf.mxu1 }
 0x451   :  { %v2494_v45 = vadd.f32 %v2366_v27, %v4453_v21  ;;  %v3199_v39 = vmul.f32 -1.442695, %v2491_v3  ;;  %3723 = vpow2.f32 %v3198_v19 }
 0x452   :  { %v2368_v50 = vpop.f32.mrf.mxu1 }
 0x453   :  { %v2495_v63 = vadd.f32 %v2368_v50, %v4480_v1  ;;  %v3201_v40 = vmul.f32 -1.442695, %v2494_v45  ;;  %3725 = vpow2.f32 %v3199_v39 }
 0x455   :  { %v3202_v5 = vmul.f32 -1.442695, %v2495_v63  ;;  %3727 = vpow2.f32 %v3201_v40 }
 0x457   :  { %3729 = vpow2.f32 %v3202_v5 }
 0x458   :  { %v2372_v16 = vpop.f32.mrf.mxu1 }
 0x459   :  { %v2498_v10 = vadd.f32 %v2372_v16, %v4466_v12 }
 0x45a   :  { %v2374_v11 = vpop.f32.mrf.mxu1 }
 0x45b   :  { %v2499_v57 = vadd.f32 %v2374_v11, %v4497_v18  ;;  %v3204_v42 = vmul.f32 -1.442695, %v2498_v10 }
 0x45c   :  { %v2376_v61 = vpop.f32.mrf.mxu1 }
 0x45d   :  { %v2502_v9 = vadd.f32 %v2376_v61, %v4484_v4  ;;  %v3205_v13 = vmul.f32 -1.442695, %v2499_v57  ;;  %3731 = vpow2.f32 %v3204_v42 }
 0x45e   :  { %v2378_v62 = vpop.f32.mrf.mxu1  ;;  %v3724_v10 = vpop.eup %3723 }
 0x45f   :  { %v2503_v1 = vadd.f32 %v2378_v62, %v4508_v47  ;;  %v3207_v27 = vmul.f32 -1.442695, %v2502_v9  ;;  %3733 = vpow2.f32 %v3205_v13 }
 0x460   :  { %v2382_v20 = vpop.f32.mrf.mxu1  ;;  %v3726_v57 = vpop.eup %3725 }
 0x461   :  { %v2506_v50 = vadd.f32 %v2382_v20, %v4504_v41  ;;  %v3208_v16 = vmul.f32 -1.442695, %v2503_v1  ;;  %3735 = vpow2.f32 %v3207_v27  ;;  %v2607_v20 = vadd.f32 1.0, %v3724_v10 }
 0x462   :  { %v2384_v58 = vpop.f32.mrf.mxu1  ;;  %v3728_v11 = vpop.eup %3727  ;;  %v2608_v3 = vadd.f32 1.0, %v3726_v57 }
 0x463   :  { %v3210_v18 = vmul.f32 -1.442695, %v2506_v50  ;;  %3737 = vpow2.f32 %v3208_v16  ;;  %v2507_v45 = vadd.f32 %v2384_v58, %v4532_v14  ;;  %v2610_v19 = vadd.f32 1.0, %v3728_v11 }
 0x464   :  { %v2386_v34 = vpop.f32.mrf.mxu1  ;;  %v3730_v62 = vpop.eup %3729 }
 0x465   :  { %v2510_v4 = vadd.f32 %v2386_v34, %v4525_v46  ;;  %3739 = vpow2.f32 %v3210_v18  ;;  %v2611_v34 = vadd.f32 1.0, %v3730_v62  ;;  %v3211_v42 = vmul.f32 -1.442695, %v2507_v45 }
 0x466   :  { %v2388_v54 = vpop.f32.mrf.mxu1 }
 0x467   :  { %v3213_v61 = vmul.f32 -1.442695, %v2510_v4  ;;  %v2511_v46 = vadd.f32 %v2388_v54, %v4553_v60 }
 0x469   :  { %3741 = vpow2.f32 %v3213_v61  ;;  %v3214_v27 = vmul.f32 -1.442695, %v2511_v46 }
 0x46a   :  { %v3732_v40 = vpop.eup %3731  ;;  %3743 = vrcp.f32 %v2607_v20 }
 0x46b   :  { %3745 = vrcp.f32 %v2608_v3  ;;  %v2613_v14 = vadd.f32 1.0, %v3732_v40 }
 0x46c   :  { %v3734_v13 = vpop.eup %3733  ;;  %3747 = vrcp.f32 %v2610_v19 }
 0x46d   :  { %v2392_v21 = vpop.f32.mrf.mxu1  ;;  %3749 = vrcp.f32 %v2611_v34  ;;  %v2614_v4 = vadd.f32 1.0, %v3734_v13 }
 0x46e   :  { %v3736_v16 = vpop.eup %3735  ;;  %v2514_v58 = vadd.f32 %v2392_v21, %v4546_v55 }
 0x46f   :  { %v2394_v53 = vpop.f32.mrf.mxu1  ;;  %v2616_v10 = vadd.f32 1.0, %v3736_v16 }
 0x470   :  { %v3738_v18 = vpop.eup %3737  ;;  %v2515_v57 = vadd.f32 %v2394_v53, %v4598_v37  ;;  %v3216_v61 = vmul.f32 -1.442695, %v2514_v58 }
 0x471   :  { %v2396_v12 = vpop.f32.mrf.mxu1  ;;  %v2617_v20 = vadd.f32 1.0, %v3738_v18 }
 0x472   :  { %v3740_v62 = vpop.eup %3739  ;;  %v2518_v55 = vadd.f32 %v2396_v12, %v4574_v29  ;;  %v3217_v3 = vmul.f32 -1.442695, %v2515_v57 }
 0x473   :  { %v4690_v2 = vpop.f32.mrf.mxu1 }
 0x474   :  { %v3219_v53 = vmul.f32 -1.442695, %v2518_v55 }
 0x475   :  { %v4693_v5 = vpop.f32.mrf.mxu1 }
 0x476   :  { %v3742_v37 = vpop.eup %3741  ;;  %v2522_v16 = vadd.f32 %v4693_v5, %v4595_v30 }
 0x477   :  { %v4695_v47 = vpop.f32.mrf.mxu1  ;;  %v4706_v34 = vpop.eup %3743 }
 0x478   :  { %v4708_v12 = vpop.eup %3745  ;;  %v3222_v5 = vmul.f32 -1.442695, %v2522_v16 }
 0x479   :  { %v2406_v41 = vpop.f32.mrf.mxu1  ;;  %v4711_v40 = vpop.eup %3747 }
 0x47b   :  { %v2407_v63 = vpop.f32.mrf.mxu1 }
 0x47c   :  { %v2619_v63 = vadd.f32 1.0, %v3740_v62 }
 0x47d   :  { %v2443_v39 = vpop.f32.mrf.mxu1 }
 0x47e   :  { %v2492_v9 = vadd.f32 %v2443_v39, %v4447_v48 }
 0x47f   :  { %v2445_v1 = vpop.f32.mrf.mxu1 }
 0x480   :  { %v3200_v50 = vmul.f32 -1.442695, %v2492_v9  ;;  %v2622_v9 = vadd.f32 1.0, %v3742_v37 }
 0x481   :  { %v2447_v60 = vpop.f32.mrf.mxu1 }
 0x482   :  { %3751 = vpow2.f32 %v3200_v50  ;;  %v2496_v54 = vadd.f32 %v2447_v60, %v4459_v44 }
 0x483   :  { %3753 = vpow2.f32 %v3211_v42  ;;  %v2449_v48 = vpop.f32.mrf.mxu1  ;;  %v2519_v42 = vadd.f32 %v4690_v2, %v4604_v25 }
 0x484   :  { %3755 = vpow2.f32 %v3214_v27  ;;  %v3203_v11 = vmul.f32 -1.442695, %v2496_v54  ;;  %v4715_v27 = vpop.eup %3749  ;;  %v2497_v58 = vadd.f32 %v2449_v48, %v4494_v43  ;;  %v2523_v43 = vadd.f32 %v4695_v47, %v4625_v36 }
 0x485   :  { %3757 = vrcp.f32 %v2613_v14  ;;  %v2453_v41 = vpop.f32.mrf.mxu1  ;;  %v3220_v2 = vmul.f32 -1.442695, %v2519_v42 }
 0x486   :  { %3759 = vpow2.f32 %v3203_v11  ;;  %v2500_v21 = vadd.f32 %v2453_v41, %v4473_v7  ;;  %v2493_v7 = vadd.f32 %v2445_v1, %v4487_v6  ;;  %v3223_v36 = vmul.f32 -1.442695, %v2523_v43 }
 0x487   :  { %3761 = vrcp.f32 %v2614_v4  ;;  %v2455_v44 = vpop.f32.mrf.mxu1 }
 0x488   :  { %3763 = vrcp.f32 %v2616_v10  ;;  %v3206_v45 = vmul.f32 -1.442695, %v2500_v21 }
 0x489   :  { %3765 = vpow2.f32 %v3216_v61  ;;  %v2457_v19 = vpop.f32.mrf.mxu1  ;;  %v2501_v61 = vadd.f32 %v2455_v44, %v4540_v15 }
 0x48a   :  { %3767 = vrcp.f32 %v2617_v20  ;;  %v2504_v46 = vadd.f32 %v2457_v19, %v4491_v17  ;;  %v4841_v19 = vld [vmem:[#allocation14_spill] sm:$0xff] }
 0x48b   :  { %3769 = vpow2.f32 %v3206_v45  ;;  %v2459_v29 = vpop.f32.mrf.mxu1 }
 0x48c   :  { %3771 = vpow2.f32 %v3217_v3  ;;  %v3209_v39 = vmul.f32 -1.442695, %v2504_v46 }
 0x48d   :  { %3773 = vrcp.f32 %v2619_v63  ;;  %v2463_v13 = vpop.f32.mrf.mxu1  ;;  %v2505_v63 = vadd.f32 %v2459_v29, %v4543_v31 }
 0x48e   :  { %3775 = vpow2.f32 %v3219_v53  ;;  %v2508_v17 = vadd.f32 %v2463_v13, %v4511_v22 }
 0x48f   :  { %v3752_v50 = vpop.eup %3751  ;;  %3777 = vpow2.f32 %v3209_v39  ;;  %v2465_v6 = vpop.f32.mrf.mxu1 }
 0x490   :  { %v4720_v1 = vpop.eup %3753  ;;  %v2609_v14 = vadd.f32 1.0, %v3752_v50  ;;  %3779 = vtanh.f32 %v2493_v7  ;;  %v3212_v60 = vmul.f32 -1.442695, %v2508_v17  ;;  %v2509_v42 = vadd.f32 %v2465_v6, %v4571_v33 }
 0x491   :  { %v4723_v25 = vpop.eup %3755  ;;  %3781 = vrcp.f32 %v2622_v9  ;;  %v2467_v54 = vpop.f32.mrf.mxu1 }
 0x492   :  { %v4725_v18 = vpop.eup %3757  ;;  %3783 = vrcp.f32 %v2609_v14  ;;  %v2512_v22 = vadd.f32 %v2467_v54, %v4528_v26 }
 0x493   :  { %v3760_v30 = vpop.eup %3759  ;;  %3785 = vpow2.f32 %v3212_v60  ;;  %v2469_v4 = vpop.f32.mrf.mxu1 }
 0x494   :  { %v4728_v10 = vpop.eup %3761  ;;  %v2612_v48 = vadd.f32 1.0, %v3760_v30  ;;  %3787 = vtanh.f32 %v2497_v58  ;;  %v3215_v57 = vmul.f32 -1.442695, %v2512_v22  ;;  %v2513_v60 = vadd.f32 %v2469_v4, %v4592_v49 }
 0x495   :  { %v4732_v11 = vpop.eup %3763  ;;  %3789 = vpow2.f32 %v3220_v2  ;;  %v2473_v41 = vpop.f32.mrf.mxu1 }
 0x496   :  { %v3766_v62 = vpop.eup %3765  ;;  %3791 = vrcp.f32 %v2612_v48  ;;  %v2516_v26 = vadd.f32 %v2473_v41, %v4549_v51 }
 0x497   :  { %v4736_v20 = vpop.eup %3767  ;;  %3793 = vpow2.f32 %v3215_v57  ;;  %v2475_v55 = vpop.f32.mrf.mxu1  ;;  %v2625_v4 = vadd.f32 1.0, %v3766_v62 }
 0x498   :  { %v3770_v21 = vpop.eup %3769  ;;  %3795 = vpow2.f32 %v3222_v5  ;;  %v3218_v47 = vmul.f32 -1.442695, %v2516_v26  ;;  %v2517_v33 = vadd.f32 %v2475_v55, %v4610_v32 }
 0x499   :  { %v4738_v3 = vpop.eup %3771  ;;  %v2615_v45 = vadd.f32 1.0, %v3770_v21  ;;  %3797 = vtanh.f32 %v2501_v61  ;;  %v2477_v15 = vpop.f32.mrf.mxu1 }
 0x49a   :  { %v4741_v44 = vpop.eup %3773  ;;  %3799 = vpow2.f32 %v3218_v47  ;;  %v2520_v51 = vadd.f32 %v2477_v15, %v4841_v19 }
 0x49b   :  { %v3776_v37 = vpop.eup %3775  ;;  %3801 = vrcp.f32 %v2615_v45  ;;  %v2479_v53 = vpop.f32.mrf.mxu1 }
 0x49c   :  { %v3778_v46 = vpop.eup %3777  ;;  %3803 = vpow2.f32 %v3223_v36  ;;  %v3221_v7 = vmul.f32 -1.442695, %v2520_v51  ;;  %v2628_v26 = vadd.f32 1.0, %v3776_v37  ;;  %v2521_v36 = vadd.f32 %v2479_v53, %v4622_v35  ;;  %v4842_v35 = vld [vmem:[#allocation15_spill] sm:$0xff] }
 0x49d   :  { %v3780_v39 = vpop.eup %3779  ;;  %v2618_v9 = vadd.f32 1.0, %v3778_v46  ;;  %3805 = vtanh.f32 %v2505_v63  ;;  %v2483_v13 = vpop.f32.mrf.mxu1 }
 0x49e   :  { %v4745_v17 = vpop.eup %3781  ;;  %3807 = vpow2.f32 %v3221_v7  ;;  %v2524_v31 = vadd.f32 %v2483_v13, %v4577_v56  ;;  %v2706_v58 = vmul.f32 %v3780_v39, %v4706_v34  ;;  %v4843_v13 = vld [vmem:[#allocation16_spill] sm:$0xff] }
 0x49f   :  { %v3784_v29 = vpop.eup %3783  ;;  %3809 = vrcp.f32 %v2618_v9  ;;  %v2485_v50 = vpop.f32.mrf.mxu1 }
 0x4a0   :  { %v3786_v16 = vpop.eup %3785  ;;  %v2697_v14 = vmul.f32 %v3784_v29, %v4579_v38  ;;  %v3224_v2 = vmul.f32 -1.442695, %v2524_v31  ;;  %3811 = vtanh.f32 %v2509_v42  ;;  %v2525_v37 = vadd.f32 %v2485_v50, %v4641_v0 }
 0x4a1   :  { %v3788_v54 = vpop.eup %3787  ;;  %v2621_v22 = vadd.f32 1.0, %v3786_v16  ;;  %v2487_v6 = vpop.f32.mrf.mxu1  ;;  %v2620_v50 = vadd.f32 1.0, %v4720_v1 }
 0x4a2   :  { %v4752_v30 = vpop.eup %3789  ;;  %v2715_v56 = vadd.f32 %v2706_v58, %v2697_v14  ;;  %3813 = vpow2.f32 %v3224_v2  ;;  %v2707_v34 = vmul.f32 %v3788_v54, %v4711_v40  ;;  %v2623_v58 = vadd.f32 1.0, %v4723_v25  ;;  %v4844_v2 = vld [vmem:[#allocation17_spill] sm:$0xff] }
 0x4a3   :  { %v3792_v5 = vpop.eup %3791  ;;  %3815 = vrcp.f32 %v2621_v22  ;;  %v2488_v43 = vpop.f32.mrf.mxu1 }
 0x4a4   :  { %v3794_v48 = vpop.eup %3793  ;;  %v2698_v38 = vmul.f32 %v3792_v5, %v4589_v52  ;;  %3817 = vtanh.f32 %v2513_v60 }
 0x4a5   :  { %v3796_v49 = vpop.eup %3795  ;;  %v2624_v57 = vadd.f32 1.0, %v3794_v48  ;;  %3819 = vtanh.f32 %v2517_v33 }
 0x4a6   :  { %v3798_v61 = vpop.eup %3797  ;;  %3821 = vtanh.f32 %v2715_v56  ;;  %v2716_v32 = vadd.f32 %v2707_v34, %v2698_v38  ;;  %v2631_v52 = vadd.f32 1.0, %v3796_v49  ;;  %v2626_v34 = vadd.f32 1.0, %v4738_v3 }
 0x4a7   :  { %v3800_v41 = vpop.eup %3799  ;;  %3823 = vrcp.f32 %v2624_v57  ;;  %v2708_v62 = vmul.f32 %v3798_v61, %v4725_v18 }
 0x4a8   :  { %v3802_v55 = vpop.eup %3801  ;;  %3825 = vtanh.f32 %v2716_v32  ;;  %v2627_v21 = vadd.f32 1.0, %v3800_v41 }
 0x4a9   :  { %v4757_v47 = vpop.eup %3803  ;;  %3827 = vrcp.f32 %v2625_v4  ;;  %v2699_v40 = vmul.f32 %v3802_v55, %v4613_v24 }
 0x4aa   :  { %v3806_v45 = vpop.eup %3805  ;;  %3829 = vrcp.f32 %v2627_v21  ;;  %v2632_v3 = vadd.f32 1.0, %v4757_v47 }
 0x4ab   :  { %v3808_v63 = vpop.eup %3807  ;;  %3831 = vrcp.f32 %v2628_v26  ;;  %v2717_v15 = vadd.f32 %v2708_v62, %v2699_v40  ;;  %v2709_v46 = vmul.f32 %v3806_v45, %v4732_v11  ;;  %v4845_v62 = vld [vmem:[#allocation18_spill] sm:$0xff] }
 0x4ac   :  { %v3810_v19 = vpop.eup %3809  ;;  %v2630_v51 = vadd.f32 1.0, %v3808_v63  ;;  %3833 = vtanh.f32 %v2521_v36 }
 0x4ad   :  { %3835 = vrcp.f32 %v2631_v52  ;;  %v2700_v53 = vmul.f32 %v3810_v19, %v4842_v35  ;;  %v3812_v7 = vpop.eup %3811 }
 0x4ae   :  { %3837 = vrcp.f32 %v2630_v51  ;;  %v2710_v29 = vmul.f32 %v3812_v7, %v4741_v44 }
 0x4af   :  { %v3814_v24 = vpop.eup %3813  ;;  %3839 = vtanh.f32 %v2717_v15  ;;  %v2718_v18 = vadd.f32 %v2709_v46, %v2700_v53 }
 0x4b0   :  { %v3816_v39 = vpop.eup %3815  ;;  %v2633_v9 = vadd.f32 1.0, %v3814_v24  ;;  %3841 = vtanh.f32 %v2525_v37 }
 0x4b1   :  { %v3818_v42 = vpop.eup %3817  ;;  %3843 = vtanh.f32 %v2718_v18  ;;  %v2701_v31 = vmul.f32 %v3816_v39, %v4843_v13  ;;  %v4847_v39 = vld [vmem:[#allocation20_spill] sm:$0xff]  ;;  %v4849_v13 = vld [vmem:[#allocation13_spill] sm:$0xff] }
 0x4b2   :  { %v3820_v0 = vpop.eup %3819  ;;  %3845 = vrcp.f32 %v2633_v9  ;;  %v2711_v22 = vmul.f32 %v3818_v42, %v4745_v17  ;;  %v4848_v42 = vld [vmem:[#allocation21_spill] sm:$0xff] }
 0x4b3   :  { %v3822_v16 = vpop.eup %3821  ;;  %v2719_v11 = vadd.f32 %v2710_v29, %v2701_v31  ;;  %3847 = vrcp.f32 %v2620_v50  ;;  %v2781_v31 = vsub.s32 3, %v4849_v13 }
 0x4b4   :  { %v3824_v14 = vpop.eup %3823  ;;  %v2733_v6 = vmul.f32 %v3822_v16, %v4708_v12  ;;  %v2629_v12 = vadd.f32 1.0, %v4752_v30 }
 0x4b5   :  { %v3826_v60 = vpop.eup %3825  ;;  %v2702_v54 = vmul.f32 %v3824_v14, %v4844_v2  ;;  %3849 = vtanh.f32 %v2719_v11 }
 0x4b6   :  { %v3828_v33 = vpop.eup %3827  ;;  %v2734_v44 = vmul.f32 %v3826_v60, %v4715_v27  ;;  %3851 = vrcp.f32 %v2623_v58 }
 0x4b7   :  { %v3830_v56 = vpop.eup %3829  ;;  %v2720_v1 = vadd.f32 %v2711_v22, %v2702_v54  ;;  %v2712_v48 = vmul.f32 %v3828_v33, %v3820_v0  ;;  %v3869_v0 = vld [vmem:[#allocation9] sm:$0xff] }
 0x4b8   :  { %v3832_v5 = vpop.eup %3831  ;;  %v2703_v43 = vmul.f32 %v3830_v56, %v4647_v59  ;;  %v2742_v25 = vpack.c.bf16 %v2734_v44, %v2733_v6  ;;  %v2782_v50 = vrot.slane %v3869_v0, %v2781_v31 }
 0x4b9   :  { %v3834_v38 = vpop.eup %3833  ;;  %3853 = vtanh.f32 %v2720_v1 }
 0x4ba   :  { %v3836_v17 = vpop.eup %3835  ;;  %v2721_v49 = vadd.f32 %v2712_v48, %v2703_v43  ;;  %2911 = vmatprep.mubr.bf16.mxu0 %v2742_v25  ;;  %v2713_v61 = vmul.f32 %v3834_v38, %v3832_v5  ;;  %3855 = vrcp.f32 %v2626_v34 }
 0x4bb   :  { %v3838_v4 = vpop.eup %3837  ;;  %2912 = vmatmul.mubr.bf16.vlgmr.msra.gmra.mxu0 %v4635_v8 }
 0x4bc   :  { %v3840_v27 = vpop.eup %3839  ;;  %v2704_v57 = vmul.f32 %v3838_v4, %v4652_v28  ;;  %3857 = vtanh.f32 %v2721_v49 }
 0x4bd   :  { %v3842_v32 = vpop.eup %3841  ;;  %3859 = vrcp.f32 %v2629_v12  ;;  %v2735_v55 = vmul.f32 %v3840_v27, %v4728_v10 }
 0x4be   :  { %v3844_v59 = vpop.eup %3843  ;;  %v2722_v41 = vadd.f32 %v2713_v61, %v2704_v57  ;;  %v2714_v30 = vmul.f32 %v3842_v32, %v3836_v17 }
 0x4bf   :  { %v3846_v26 = vpop.eup %3845  ;;  %v2736_v21 = vmul.f32 %v3844_v59, %v4736_v20 }
 0x4c0   :  { %3861 = vtanh.f32 %v2722_v41  ;;  %v2705_v8 = vmul.f32 %v3846_v26, %v4659_v23  ;;  %v3848_v52 = vpop.eup %3847  ;;  %v4846_v23 = vld [vmem:[#allocation19_spill] sm:$0xff] }
 0x4c1   :  { %v2743_v36 = vpack.c.bf16 %v2736_v21, %v2735_v55  ;;  %3863 = vrcp.f32 %v2632_v3 }
 0x4c2   :  { %v2723_v28 = vadd.f32 %v2714_v30, %v2705_v8  ;;  %v3850_v40 = vpop.eup %3849 }
 0x4c3   :  { %2919 = vmatprep.mubr.bf16.mxu0 %v2743_v36  ;;  %v3852_v45 = vpop.eup %3851  ;;  %v2737_v47 = vmul.f32 %v3850_v40, %v3848_v52 }
 0x4c4   :  { %3865 = vtanh.f32 %v2723_v28  ;;  %2920 = vmatmul.mubr.bf16.gmra.mxu0 %v4845_v62 }
 0x4c6   :  { %v3854_v63 = vpop.eup %3853 }
 0x4c7   :  { %v2738_v15 = vmul.f32 %v3854_v63, %v3852_v45  ;;  %v3856_v19 = vpop.eup %3855 }
 0x4c9   :  { %v2744_v10 = vpack.c.bf16 %v2738_v15, %v2737_v47  ;;  %v3858_v20 = vpop.eup %3857 }
 0x4ca   :  { %v3860_v51 = vpop.eup %3859  ;;  %v2739_v35 = vmul.f32 %v3858_v20, %v3856_v19 }
 0x4cb   :  { %2927 = vmatprep.mubr.bf16.mxu0 %v2744_v10 }
 0x4cc   :  { %2928 = vmatmul.mubr.bf16.gmra.mxu0 %v4846_v23 }
 0x4cd   :  { %v3862_v37 = vpop.eup %3861 }
 0x4ce   :  { %v2740_v53 = vmul.f32 %v3862_v37, %v3860_v51  ;;  %v3864_v46 = vpop.eup %3863 }
 0x4d0   :  { %v2745_v7 = vpack.c.bf16 %v2740_v53, %v2739_v35 }
 0x4d1   :  { %v3866_v24 = vpop.eup %3865 }
 0x4d2   :  { %2935 = vmatprep.mubr.bf16.mxu0 %v2745_v7  ;;  %v2741_v18 = vmul.f32 %v3866_v24, %v3864_v46 }
 0x4d4   :  { %2936 = vmatmul.mubr.bf16.gmra.mxu0 %v4847_v39  ;;  %v2746_v9 = vpack.c.bf16 %v2741_v18, %v2741_v18 }
 0x4d6   :  { %2943 = vmatprep.mubr.bf16.mxu0 %v2746_v9 }
 0x4dc   :  { %2944 = vmatmul.mubr.bf16.gmra.mxu0 %v4848_v42 }
 0x57b   :  { %v3257_v29 = vpop.f32.mrf.mxu0 }
 0x57d   :  { %v3258_v16 = vpop.f32.mrf.mxu0 }
 0x57e   :  { %v3259_v11 = vadd.f32 %v3258_v16, %v3257_v29 }
 0x57f   :  { %v3260_v14 = vpop.f32.mrf.mxu0 }
 0x580   :  { %v2914_v58 = vadd.f32 %v3259_v11, %v2782_v50 }
 0x581   :  { %v3261_v60 = vpop.f32.mrf.mxu0 }
 0x582   :  { %2951 = vst [vmem:[%s4820_s7] sm:$0xff] %v2914_v58  ;;  %v3262_v2 = vadd.f32 %v3261_v60, %v3260_v14 }
 0x584   :  { %v2917_v54 = vadd.f32 %v3262_v2, %v2782_v50  ;;  %v3263_v22 = vpop.f32.mrf.mxu0 }
 0x586   :  { %2952 = vst [vmem:[%s4820_s7 + $0x8] sm:$0xff] %v2917_v54  ;;  %v3264_v33 = vpop.f32.mrf.mxu0 }
 0x587   :  { %v3265_v6 = vadd.f32 %v3264_v33, %v3263_v22 }
 0x588   :  { %v3266_v44 = vpop.f32.mrf.mxu0 }
 0x589   :  { %v2922_v56 = vadd.f32 %v3265_v6, %v2782_v50 }
 0x58a   :  { %v3267_v1 = vpop.f32.mrf.mxu0 }
 0x58b   :  { %2953 = vst [vmem:[%s4820_s7 + $0x10] sm:$0xff] %v2922_v56  ;;  %v3268_v5 = vadd.f32 %v3267_v1, %v3266_v44 }
 0x58c   :  { %v3269_v43 = vpop.f32.mrf.mxu0 }
 0x58d   :  { %v2925_v48 = vadd.f32 %v3268_v5, %v2782_v50 }
 0x58e   :  { %v3270_v25 = vpop.f32.mrf.mxu0 }
 0x58f   :  { %2954 = vst [vmem:[%s4820_s7 + $0x18] sm:$0xff] %v2925_v48  ;;  %v3271_v38 = vadd.f32 %v3270_v25, %v3269_v43 }
 0x590   :  { %v3272_v34 = vpop.f32.mrf.mxu0 }
 0x591   :  { %v2930_v17 = vadd.f32 %v3271_v38, %v2782_v50 }
 0x592   :  { %v3273_v49 = vpop.f32.mrf.mxu0 }
 0x593   :  { %2955 = vst [vmem:[%s4820_s7 + $0x20] sm:$0xff] %v2930_v17  ;;  %v3274_v4 = vadd.f32 %v3273_v49, %v3272_v34 }
 0x594   :  { %v3275_v12 = vpop.f32.mrf.mxu0 }
 0x595   :  { %v2933_v27 = vadd.f32 %v3274_v4, %v2782_v50 }
 0x596   :  { %v3276_v57 = vpop.f32.mrf.mxu0 }
 0x597   :  { %2956 = vst [vmem:[%s4820_s7 + $0x28] sm:$0xff] %v2933_v27  ;;  %v3277_v61 = vadd.f32 %v3276_v57, %v3275_v12 }
 0x598   :  { %v3278_v32 = vpop.f32.mrf.mxu0 }
 0x599   :  { %v2938_v59 = vadd.f32 %v3277_v61, %v2782_v50 }
 0x59a   :  { %v3279_v41 = vpop.f32.mrf.mxu0 }
 0x59b   :  { %2957 = vst [vmem:[%s4820_s7 + $0x30] sm:$0xff] %v2938_v59  ;;  %v3280_v26 = vadd.f32 %v3279_v41, %v3278_v32 }
 0x59c   :  { %v3281_v3 = vpop.f32.mrf.mxu0 }
 0x59d   :  { %v2941_v55 = vadd.f32 %v3280_v26, %v2782_v50 }
 0x59e   :  { %v3282_v21 = vpop.f32.mrf.mxu0 }
 0x59f   :  { %2958 = vst [vmem:[%s4820_s7 + $0x38] sm:$0xff] %v2941_v55  ;;  %v3283_v8 = vadd.f32 %v3282_v21, %v3281_v3 }
 0x5a0   :  { %v3284_v30 = vpop.f32.mrf.mxu0 }
 0x5a1   :  { %v2946_v36 = vadd.f32 %v3283_v8, %v2782_v50 }
 0x5a2   :  { %v3285_v28 = vpop.f32.mrf.mxu0 }
 0x5a3   :  { %2959 = vst [vmem:[%s4820_s7 + $0x40] sm:$0xff] %v2946_v36 }
 0x5a4   :  { %2964 = vsyncpa [#allocation3], 1 }
 0x5a5   :  { %2965 = vsyncpa [#allocation5], 1 }
 0x5a6   :  { %2966 = vsyncpa [#allocation8], 1 }

</bundles_post_ra>
